<compile_context>
chip_gen: v7x
topology: tpu7x:2x2x1
jax: 0.10.0
libtpu: 0.0.40
codegen_flags: <defaults>
</compile_context>

<pallas_src>
import jax
import jax.numpy as jnp
from jax.experimental import pallas as pl
from jax.experimental.pallas import tpu as pltpu


def _add_conv1x1_kernel(a_ref, b_ref, w_ref, o_ref):
    # a_ref, b_ref: (Cin, M)      f32  -- fused elementwise add on the VPU
    # w_ref:        (tCout, Cin)  f32  -- cast to bf16 in-kernel (hidden under DMA)
    # o_ref:        (tCout, M)    f32
    x = (a_ref[...] + b_ref[...]).astype(jnp.bfloat16)            # (Cin, M)
    w = w_ref[...].astype(jnp.bfloat16)                           # (tCout, Cin)
    o_ref[...] = jnp.dot(
        w, x, preferred_element_type=jnp.float32
    ).astype(o_ref.dtype)                                          # (tCout, M)


def _default_cout_tile(cout):
    """Pick Cout tiling per TPU generation.

    v7x has 2 TensorCores per chip -> split Cout in 2 "parallel" tiles so both
    cores work.  v5e / v6e have a single TensorCore -> one grid step (no
    per-step overhead, whole ~4 MB working set fits default scoped VMEM).
    """
    try:
        kind = jax.devices()[0].device_kind.lower()
    except Exception:
        return cout
    if "v7" in kind and cout % 2 == 0 and (cout // 2) % 8 == 0:
        return cout // 2
    return cout


def add_conv1x1(x293, x279, weight, *, cout_tile=None):
    """x293, x279: (1, Cin, H, W) f32; weight: (Cout, Cin, 1, 1) f32."""
    N, Cin, H, W = x293.shape
    Cout = weight.shape[0]
    # The zero-copy (Cin, M) view relies on N == 1 (matches the module spec).
    assert N == 1, "fast NCHW path assumes batch size 1"
    M = H * W
    if cout_tile is None:
        cout_tile = _default_cout_tile(Cout)
    assert Cout % cout_tile == 0 and cout_tile % 8 == 0

    a2d = x293.reshape(Cin, M)          # free view (NCHW, N=1)
    b2d = x279.reshape(Cin, M)          # free view
    w2d = weight.reshape(Cout, Cin)     # free view, stays f32 (cast in-kernel)

    grid = (Cout // cout_tile,)
    cost = pl.CostEstimate(
        flops=2 * M * Cin * Cout,
        transcendentals=0,
        bytes_accessed=(a2d.size + b2d.size + w2d.size + Cout * M) * 4,
    )

    out2d = pl.pallas_call(
        _add_conv1x1_kernel,
        out_shape=jax.ShapeDtypeStruct((Cout, M), jnp.float32),
        grid=grid,
        in_specs=[
            # Same block index every step -> activations stay resident in VMEM.
            pl.BlockSpec((Cin, M), lambda i: (0, 0)),
            pl.BlockSpec((Cin, M), lambda i: (0, 0)),
            pl.BlockSpec((cout_tile, Cin), lambda i: (i, 0)),
        ],
        out_specs=pl.BlockSpec((cout_tile, M), lambda i: (i, 0)),
        compiler_params=pltpu.CompilerParams(
            dimension_semantics=("parallel",),
        ),
        cost_estimate=cost,
    )(a2d, b2d, w2d)

    # (Cout, M) -> (1, Cout, H, W): free reshape, no transpose needed.
    return out2d.reshape(N, Cout, H, W)


if __name__ == "__main__":
    key = jax.random.PRNGKey(0)
    k1, k2, k3 = jax.random.split(key, 3)

    N, Cin, H, W, Cout = 1, 160, 14, 14, 960

    x293 = jax.random.normal(k1, (N, Cin, H, W), dtype=jnp.float32)
    x279 = jax.random.normal(k2, (N, Cin, H, W), dtype=jnp.float32)
    # Conv2d(160, 960, 1x1, bias=False) weight, deterministic init
    weight = jax.random.normal(k3, (Cout, Cin, 1, 1), dtype=jnp.float32) * 0.05

    out = jax.block_until_ready(add_conv1x1(x293, x279, weight))
    assert out.shape == (N, Cout, H, W), out.shape

    # --- Correctness checks -------------------------------------------------
    w2 = weight.reshape(Cout, Cin)
    s2 = (x293 + x279).reshape(Cin, H * W)

    # (1) Tight check against a reference with the exact same bf16 operand
    #     rounding as the kernel (f32 accumulation in both).
    ref_bf16 = jnp.einsum(
        "oc,cm->om",
        w2.astype(jnp.bfloat16).astype(jnp.float32),
        s2.astype(jnp.bfloat16).astype(jnp.float32),
        precision=jax.lax.Precision.HIGHEST,
    ).reshape(N, Cout, H, W)
    assert jnp.allclose(out, ref_bf16, atol=2e-3, rtol=2e-3), float(
        jnp.max(jnp.abs(out - ref_bf16))
    )

    # (2) Loose check against the pure-f32 module semantics (slack accounts
    #     for the bf16 MXU operands).
    # TODO(synk): switch the dot to f32 (or bf16x3) passes if strict f32 parity
    # with the PyTorch module is required; compute would still hide under HBM.
    ref_f32 = jnp.einsum(
        "oc,cm->om", w2, s2, precision=jax.lax.Precision.HIGHEST
    ).reshape(N, Cout, H, W)
    assert jnp.allclose(out, ref_f32, atol=3e-2, rtol=3e-2), float(
        jnp.max(jnp.abs(out - ref_f32))
    )

    print("KERNEL_OK")
</pallas_src>

<mosaic_0001>
module attributes {stable_mosaic.version = 11 : i64} {
  func.func @_add_conv1x1_kernel(%arg0: i32, %arg1: memref<160x196xf32, #tpu.memory_space<vmem>>, %arg2: memref<160x196xf32, #tpu.memory_space<vmem>>, %arg3: memref<960x160xf32, #tpu.memory_space<vmem>>, %arg4: memref<960x196xf32, #tpu.memory_space<vmem>>) attributes {dimension_semantics = [#tpu.dimension_semantics<parallel>], iteration_bounds = array<i64: 1>, scalar_prefetch = 0 : i64, scratch_operands = 0 : i64, tpu.core_type = #tpu.core_type<tc>, window_params = [{pipeline_mode = #tpu.pipeline_mode<synchronous>, transform_indices = @transform_0, window_bounds = array<i64: 160, 196>}, {pipeline_mode = #tpu.pipeline_mode<synchronous>, transform_indices = @transform_1, window_bounds = array<i64: 160, 196>}, {transform_indices = @transform_2, window_bounds = array<i64: 960, 160>}, {transform_indices = @transform_3, window_bounds = array<i64: 960, 196>}]} {
    %c0 = arith.constant 0 : index
    %c0_0 = arith.constant 0 : index
    %0 = vector.load %arg1[%c0, %c0_0] : memref<160x196xf32, #tpu.memory_space<vmem>>, vector<160x196xf32>
    %c0_1 = arith.constant 0 : index
    %c0_2 = arith.constant 0 : index
    %1 = vector.load %arg2[%c0_1, %c0_2] : memref<160x196xf32, #tpu.memory_space<vmem>>, vector<160x196xf32>
    %2 = arith.addf %0, %1 : vector<160x196xf32>
    %3 = arith.truncf %2 : vector<160x196xf32> to vector<160x196xbf16>
    %c0_3 = arith.constant 0 : index
    %c0_4 = arith.constant 0 : index
    %4 = vector.load %arg3[%c0_3, %c0_4] : memref<960x160xf32, #tpu.memory_space<vmem>>, vector<960x160xf32>
    %5 = arith.truncf %4 : vector<960x160xf32> to vector<960x160xbf16>
    %cst = arith.constant dense<0.000000e+00> : vector<960x196xf32>
    %6 = tpu.matmul %5, %3, %cst {dimension_numbers = #tpu.dot_dimension_numbers<[1], [0], [0], [1], [0, 0, 1, 1], [], []>} : vector<960x160xbf16>, vector<160x196xbf16>, vector<960x196xf32> -> vector<960x196xf32>
    %c0_5 = arith.constant 0 : index
    %c0_6 = arith.constant 0 : index
    %7 = vector.load %arg4[%c0_5, %c0_6] : memref<960x196xf32, #tpu.memory_space<vmem>>, vector<960x196xf32>
    tpu.vector_store %arg4[%c0_5, %c0_6], %6 {strides = array<i32>} : memref<960x196xf32, #tpu.memory_space<vmem>>, vector<960x196xf32>,
    return
  }
  func.func @transform_0(%arg0: i32) -> (i32, i32) {
    %c0_i32 = arith.constant 0 : i32
    %c0_i32_0 = arith.constant 0 : i32
    %c0_i32_1 = arith.constant 0 : i32
    return %c0_i32, %c0_i32_0 : i32, i32
  }
  func.func @transform_1(%arg0: i32) -> (i32, i32) {
    %c0_i32 = arith.constant 0 : i32
    %c0_i32_0 = arith.constant 0 : i32
    %c0_i32_1 = arith.constant 0 : i32
    return %c0_i32, %c0_i32_0 : i32, i32
  }
  func.func @transform_2(%arg0: i32) -> (i32, i32) {
    %c0_i32 = arith.constant 0 : i32
    %c0_i32_0 = arith.constant 0 : i32
    return %arg0, %c0_i32 : i32, i32
  }
  func.func @transform_3(%arg0: i32) -> (i32, i32) {
    %c0_i32 = arith.constant 0 : i32
    %c0_i32_0 = arith.constant 0 : i32
    return %arg0, %c0_i32 : i32, i32
  }
}

</mosaic_0001>

<bundles_post_ra>
// kernel: tpu_custom_call.1
= control target key start
LH: loop header
LB: loop body
LE: loop exit
PB: predicated region body
PF: predicated region fallthrough
CT: control target
= control target key end

     0   :  { %vm515_vm0 = vcmask 261120   ;;  %vm1330_vm1 = vcmask 556032   ;;  %s3534_s0 = inlined_call_operand.vmem [shape: f32[160,196], index: 0, kind: input, shape index: {}]   ;;  %s3535_s1 = inlined_call_operand.vmem [shape: f32[160,196], index: 1, kind: input, shape index: {}]   ;;  %s3536_s2 = inlined_call_operand.vmem [shape: f32[960,160], index: 2, kind: input, shape index: {}]   ;;  %s3537_s3 = inlined_call_operand.vmem [shape: f32[960,196], index: 3, kind: output, shape index: {}]  }
   0x1   :  { %v16_v0 = vld [vmem:[%s3534_s0 + $0x8] sm:$0xff]  ;;  %v18_v1 = vld [vmem:[%s3534_s0 + $0x18] sm:$0xff]  ;;  %v15_v5 = vld [vmem:[%s3534_s0] sm:$0xff] }
   0x2   :  { %v56_v2 = vld [vmem:[%s3535_s1 + $0x8] sm:$0xff]  ;;  %v58_v3 = vld [vmem:[%s3535_s1 + $0x18] sm:$0xff]  ;;  %v17_v6 = vld [vmem:[%s3534_s0 + $0x10] sm:$0xff] }
   0x3   :  { %v96_v4 = vadd.f32 %v56_v2, %v16_v0  ;;  %v98_v7 = vadd.f32 %v58_v3, %v18_v1  ;;  %v55_v8 = vld [vmem:[%s3535_s1] sm:$0xff]  ;;  %v57_v9 = vld [vmem:[%s3535_s1 + $0x10] sm:$0xff]  ;;  %v20_v10 = vld [vmem:[%s3534_s0 + $0x28] sm:$0xff] }
   0x4   :  { %v95_v11 = vadd.f32 %v55_v8, %v15_v5  ;;  %v97_v12 = vadd.f32 %v57_v9, %v17_v6  ;;  %v22_v13 = vld [vmem:[%s3534_s0 + $0x38] sm:$0xff]  ;;  %v60_v14 = vld [vmem:[%s3535_s1 + $0x28] sm:$0xff]  ;;  %v19_v19 = vld [vmem:[%s3534_s0 + $0x20] sm:$0xff] }
   0x5   :  { %v62_v15 = vld [vmem:[%s3535_s1 + $0x38] sm:$0xff]  ;;  %v136_v16 = vpack.c.bf16 %v98_v7, %v96_v4  ;;  %v100_v17 = vadd.f32 %v60_v14, %v20_v10  ;;  %v21_v20 = vld [vmem:[%s3534_s0 + $0x30] sm:$0xff]  ;;  %v59_v21 = vld [vmem:[%s3535_s1 + $0x20] sm:$0xff] }
   0x6   :  { %v102_v18 = vadd.f32 %v62_v15, %v22_v13  ;;  %v135_v22 = vpack.c.bf16 %v97_v12, %v95_v11  ;;  %v61_v23 = vld [vmem:[%s3535_s1 + $0x30] sm:$0xff]  ;;  %v99_v24 = vadd.f32 %v59_v21, %v19_v19  ;;  %v24_v25 = vld [vmem:[%s3534_s0 + $0x48] sm:$0xff]  ;;  %v26_v26 = vld [vmem:[%s3534_s0 + $0x58] sm:$0xff] }
   0x7   :  { %696 = vmatprep.subr.bf16.mxu0 %v136_v16  ;;  %1634 = vmatprep.subr.bf16.mxu1 %v136_v16  ;;  %v101_v28 = vadd.f32 %v61_v23, %v21_v20  ;;  %v64_v29 = vld [vmem:[%s3535_s1 + $0x48] sm:$0xff]  ;;  %v66_v30 = vld [vmem:[%s3535_s1 + $0x58] sm:$0xff]  ;;  %v23_v31 = vld [vmem:[%s3534_s0 + $0x40] sm:$0xff] }
   0x8   :  { %v138_v27 = vpack.c.bf16 %v102_v18, %v100_v17  ;;  %697 = vmatpush1.bf16.msra.mxu0 %v135_v22  ;;  %1644 = vmatpush1.bf16.msra.mxu1 %v135_v22  ;;  %v104_v32 = vadd.f32 %v64_v29, %v24_v25  ;;  %v106_v33 = vadd.f32 %v66_v30, %v26_v26  ;;  %v25_v34 = vld [vmem:[%s3534_s0 + $0x50] sm:$0xff]  ;;  %v63_v35 = vld [vmem:[%s3535_s1 + $0x40] sm:$0xff]  ;;  %v28_v40 = vld [vmem:[%s3534_s0 + $0x68] sm:$0xff] }
   0x9   :  { %v65_v36 = vld [vmem:[%s3535_s1 + $0x50] sm:$0xff]  ;;  %v137_v37 = vpack.c.bf16 %v101_v28, %v99_v24  ;;  %v103_v38 = vadd.f32 %v63_v35, %v23_v31  ;;  %v30_v41 = vld [vmem:[%s3534_s0 + $0x78] sm:$0xff]  ;;  %v68_v42 = vld [vmem:[%s3535_s1 + $0x68] sm:$0xff] }
   0xa   :  { %698 = vmatprep.subr.bf16.mxu0 %v138_v27  ;;  %1635 = vmatprep.subr.bf16.mxu1 %v138_v27  ;;  %v105_v39 = vadd.f32 %v65_v36, %v25_v34  ;;  %v140_v43 = vpack.c.bf16 %v106_v33, %v104_v32  ;;  %v70_v44 = vld [vmem:[%s3535_s1 + $0x78] sm:$0xff]  ;;  %v108_v45 = vadd.f32 %v68_v42, %v28_v40  ;;  %v27_v46 = vld [vmem:[%s3534_s0 + $0x60] sm:$0xff]  ;;  %v29_v47 = vld [vmem:[%s3534_s0 + $0x70] sm:$0xff] }
   0xb   :  { %v110_v48 = vadd.f32 %v70_v44, %v30_v41  ;;  %v67_v49 = vld [vmem:[%s3535_s1 + $0x60] sm:$0xff]  ;;  %v69_v50 = vld [vmem:[%s3535_s1 + $0x70] sm:$0xff]  ;;  %v32_v51 = vld [vmem:[%s3534_s0 + $0x88] sm:$0xff] }
   0xc   :  { %699 = vmatpush1.bf16.msra.mxu0 %v137_v37  ;;  %1645 = vmatpush1.bf16.msra.mxu1 %v137_v37  ;;  %v139_v52 = vpack.c.bf16 %v105_v39, %v103_v38  ;;  %v107_v53 = vadd.f32 %v67_v49, %v27_v46  ;;  %v109_v54 = vadd.f32 %v69_v50, %v29_v47  ;;  %v34_v55 = vld [vmem:[%s3534_s0 + $0x98] sm:$0xff]  ;;  %v72_v56 = vld [vmem:[%s3535_s1 + $0x88] sm:$0xff]  ;;  %v31_v61 = vld [vmem:[%s3534_s0 + $0x80] sm:$0xff] }
   0xd   :  { %v74_v57 = vld [vmem:[%s3535_s1 + $0x98] sm:$0xff]  ;;  %700 = vmatprep.subr.bf16.mxu0 %v140_v43  ;;  %1636 = vmatprep.subr.bf16.mxu1 %v140_v43  ;;  %v142_v58 = vpack.c.bf16 %v110_v48, %v108_v45  ;;  %v112_v59 = vadd.f32 %v72_v56, %v32_v51  ;;  %v33_v62 = vld [vmem:[%s3534_s0 + $0x90] sm:$0xff]  ;;  %v71_v63 = vld [vmem:[%s3535_s1 + $0x80] sm:$0xff] }
   0xe   :  { %v114_v60 = vadd.f32 %v74_v57, %v34_v55  ;;  %v73_v0 = vld [vmem:[%s3535_s1 + $0x90] sm:$0xff]  ;;  %v36_v1 = vld [vmem:[%s3534_s0 + $0xa8] sm:$0xff]  ;;  %v38_v2 = vld [vmem:[%s3534_s0 + $0xb8] sm:$0xff]  ;;  %v141_v5 = vpack.c.bf16 %v109_v54, %v107_v53  ;;  %v111_v6 = vadd.f32 %v71_v63, %v31_v61 }
   0xf   :  { %v76_v3 = vld [vmem:[%s3535_s1 + $0xa8] sm:$0xff]  ;;  %v78_v4 = vld [vmem:[%s3535_s1 + $0xb8] sm:$0xff]  ;;  %v113_v7 = vadd.f32 %v73_v0, %v33_v62  ;;  %v35_v8 = vld [vmem:[%s3534_s0 + $0xa0] sm:$0xff] }
  0x10   :  { %701 = vmatpush1.bf16.msra.mxu0 %v139_v52  ;;  %1646 = vmatpush1.bf16.msra.mxu1 %v139_v52  ;;  %v37_v9 = vld [vmem:[%s3534_s0 + $0xb0] sm:$0xff]  ;;  %v144_v10 = vpack.c.bf16 %v114_v60, %v112_v59  ;;  %v116_v11 = vadd.f32 %v76_v3, %v36_v1  ;;  %v118_v12 = vadd.f32 %v78_v4, %v38_v2  ;;  %v75_v13 = vld [vmem:[%s3535_s1 + $0xa0] sm:$0xff]  ;;  %v40_v15 = vld [vmem:[%s3534_s0 + $0xc8] sm:$0xff] }
  0x11   :  { %702 = vmatprep.subr.bf16.mxu0 %v142_v58  ;;  %1637 = vmatprep.subr.bf16.mxu1 %v142_v58  ;;  %v77_v14 = vld [vmem:[%s3535_s1 + $0xb0] sm:$0xff]  ;;  %v42_v16 = vld [vmem:[%s3534_s0 + $0xd8] sm:$0xff]  ;;  %v80_v17 = vld [vmem:[%s3535_s1 + $0xc8] sm:$0xff]  ;;  %v143_v21 = vpack.c.bf16 %v113_v7, %v111_v6  ;;  %v115_v22 = vadd.f32 %v75_v13, %v35_v8 }
  0x12   :  { %v82_v18 = vld [vmem:[%s3535_s1 + $0xd8] sm:$0xff]  ;;  %v39_v19 = vld [vmem:[%s3534_s0 + $0xc0] sm:$0xff]  ;;  %v41_v20 = vld [vmem:[%s3534_s0 + $0xd0] sm:$0xff]  ;;  %v117_v23 = vadd.f32 %v77_v14, %v37_v9  ;;  %v146_v27 = vpack.c.bf16 %v118_v12, %v116_v11  ;;  %v120_v28 = vadd.f32 %v80_v17, %v40_v15 }
  0x13   :  { %v79_v24 = vld [vmem:[%s3535_s1 + $0xc0] sm:$0xff]  ;;  %v81_v25 = vld [vmem:[%s3535_s1 + $0xd0] sm:$0xff]  ;;  %v44_v26 = vld [vmem:[%s3534_s0 + $0xe8] sm:$0xff]  ;;  %v122_v29 = vadd.f32 %v82_v18, %v42_v16 }
  0x14   :  { %703 = vmatpush1.bf16.msra.mxu0 %v141_v5  ;;  %1647 = vmatpush1.bf16.msra.mxu1 %v141_v5  ;;  %v46_v30 = vld [vmem:[%s3534_s0 + $0xf8] sm:$0xff]  ;;  %v84_v31 = vld [vmem:[%s3535_s1 + $0xe8] sm:$0xff]  ;;  %v119_v33 = vadd.f32 %v79_v24, %v39_v19  ;;  %v121_v34 = vadd.f32 %v81_v25, %v41_v20  ;;  %v145_v35 = vpack.c.bf16 %v117_v23, %v115_v22  ;;  %v43_v38 = vld [vmem:[%s3534_s0 + $0xe0] sm:$0xff] }
  0x15   :  { %704 = vmatprep.subr.bf16.mxu0 %v144_v10  ;;  %1638 = vmatprep.subr.bf16.mxu1 %v144_v10  ;;  %v86_v32 = vld [vmem:[%s3535_s1 + $0xf8] sm:$0xff]  ;;  %v124_v36 = vadd.f32 %v84_v31, %v44_v26  ;;  %v45_v39 = vld [vmem:[%s3534_s0 + $0xf0] sm:$0xff]  ;;  %v83_v40 = vld [vmem:[%s3535_s1 + $0xe0] sm:$0xff]  ;;  %v148_v41 = vpack.c.bf16 %v122_v29, %v120_v28 }
  0x16   :  { %v126_v37 = vadd.f32 %v86_v32, %v46_v30  ;;  %v85_v42 = vld [vmem:[%s3535_s1 + $0xf0] sm:$0xff]  ;;  %v48_v43 = vld [vmem:[%s3534_s0 + $0x108] sm:$0xff]  ;;  %v50_v45 = vld [vmem:[%s3534_s0 + $0x118] sm:$0xff]  ;;  %v147_v47 = vpack.c.bf16 %v121_v34, %v119_v33  ;;  %v123_v48 = vadd.f32 %v83_v40, %v43_v38 }
  0x17   :  { %v88_v44 = vld [vmem:[%s3535_s1 + $0x108] sm:$0xff]  ;;  %v90_v46 = vld [vmem:[%s3535_s1 + $0x118] sm:$0xff]  ;;  %v47_v49 = vld [vmem:[%s3534_s0 + $0x100] sm:$0xff]  ;;  %v125_v53 = vadd.f32 %v85_v42, %v45_v39 }
  0x18   :  { %705 = vmatpush1.bf16.msra.mxu0 %v143_v21  ;;  %1648 = vmatpush1.bf16.msra.mxu1 %v143_v21  ;;  %v49_v50 = vld [vmem:[%s3534_s0 + $0x110] sm:$0xff]  ;;  %v156_v51 = vld [vmem:[%s3536_s2 + $0x8] sm:$0xff]  ;;  %v150_v52 = vpack.c.bf16 %v126_v37, %v124_v36  ;;  %v128_v54 = vadd.f32 %v88_v44, %v48_v43  ;;  %v158_v55 = vld [vmem:[%s3536_s2 + $0x18] sm:$0xff]  ;;  %v130_v58 = vadd.f32 %v90_v46, %v50_v45 }
  0x19   :  { %706 = vmatprep.subr.bf16.mxu0 %v146_v27  ;;  %1639 = vmatprep.subr.bf16.mxu1 %v146_v27  ;;  %v276_v56 = vld [vmem:[%s3536_s2 + $0x3c8] sm:$0xff]  ;;  %v278_v57 = vld [vmem:[%s3536_s2 + $0x3d8] sm:$0xff]  ;;  %v87_v59 = vld [vmem:[%s3535_s1 + $0x100] sm:$0xff]  ;;  %v396_v62 = vpack.c.bf16 %v158_v55, %v156_v51  ;;  %v149_v3 = vpack.c.bf16 %v125_v53, %v123_v48 }
  0x1a   :  { %v89_v60 = vld [vmem:[%s3535_s1 + $0x110] sm:$0xff]  ;;  %v52_v61 = vld [vmem:[%s3534_s0 + $0x128] sm:$0xff]  ;;  %v456_v63 = vpack.c.bf16 %v278_v57, %v276_v56  ;;  %v54_v0 = vld [vmem:[%s3534_s0 + $0x138] sm:$0xff]  ;;  %v127_v4 = vadd.f32 %v87_v59, %v47_v49  ;;  %v152_v7 = vpack.c.bf16 %v130_v58, %v128_v54 }
  0x1b   :  { %v92_v1 = vld [vmem:[%s3535_s1 + $0x128] sm:$0xff]  ;;  %v94_v2 = vld [vmem:[%s3535_s1 + $0x138] sm:$0xff]  ;;  %1574 = vmatprep.mubr.msk.bf16.mxu0 %vm515_vm0, %v396_v62  ;;  %v129_v5 = vadd.f32 %v89_v60, %v49_v50  ;;  %v51_v6 = vld [vmem:[%s3534_s0 + $0x120] sm:$0xff] }
  0x1c   :  { %707 = vmatpush1.bf16.msra.mxu0 %v145_v35  ;;  %1649 = vmatpush1.bf16.msra.mxu1 %v145_v35  ;;  %v132_v8 = vadd.f32 %v92_v1, %v52_v61  ;;  %v134_v9 = vadd.f32 %v94_v2, %v54_v0  ;;  %v53_v10 = vld [vmem:[%s3534_s0 + $0x130] sm:$0xff]  ;;  %v91_v11 = vld [vmem:[%s3535_s1 + $0x120] sm:$0xff]  ;;  %v160_v22 = vld [vmem:[%s3536_s2 + $0x28] sm:$0xff] }
  0x1d   :  { %708 = vmatprep.subr.bf16.mxu0 %v148_v41  ;;  %1640 = vmatprep.subr.bf16.mxu1 %v148_v41  ;;  %v93_v12 = vld [vmem:[%s3535_s1 + $0x130] sm:$0xff]  ;;  %v151_v13 = vpack.c.bf16 %v129_v5, %v127_v4  ;;  %v131_v14 = vadd.f32 %v91_v11, %v51_v6  ;;  %v155_v17 = vld [vmem:[%s3536_s2] sm:$0xff]  ;;  %v162_v23 = vld [vmem:[%s3536_s2 + $0x38] sm:$0xff] }
  0x1e   :  { %1604 = vmatprep.mubr.msk.bf16.mxu1 %vm515_vm0, %v456_v63  ;;  %v133_v15 = vadd.f32 %v93_v12, %v53_v10  ;;  %v154_v16 = vpack.c.bf16 %v134_v9, %v132_v8  ;;  %v157_v18 = vld [vmem:[%s3536_s2 + $0x10] sm:$0xff]  ;;  %v275_v20 = vld [vmem:[%s3536_s2 + $0x3c0] sm:$0xff]  ;;  %v280_v24 = vld [vmem:[%s3536_s2 + $0x3e8] sm:$0xff]  ;;  %v398_v28 = vpack.c.bf16 %v162_v23, %v160_v22 }
  0x1f   :  { %v277_v21 = vld [vmem:[%s3536_s2 + $0x3d0] sm:$0xff]  ;;  %v282_v25 = vld [vmem:[%s3536_s2 + $0x3f8] sm:$0xff]  ;;  %v395_v26 = vpack.c.bf16 %v157_v18, %v155_v17  ;;  %v159_v30 = vld [vmem:[%s3536_s2 + $0x20] sm:$0xff] }
  0x20   :  { %709 = vmatpush1.bf16.msra.mxu0 %v147_v47  ;;  %1650 = vmatpush1.bf16.msra.mxu1 %v147_v47  ;;  %v153_v19 = vpack.c.bf16 %v133_v15, %v131_v14  ;;  %v455_v27 = vpack.c.bf16 %v277_v21, %v275_v20  ;;  %v458_v29 = vpack.c.bf16 %v282_v25, %v280_v24  ;;  %v161_v31 = vld [vmem:[%s3536_s2 + $0x30] sm:$0xff]  ;;  %v279_v32 = vld [vmem:[%s3536_s2 + $0x3e0] sm:$0xff]  ;;  %v164_v34 = vld [vmem:[%s3536_s2 + $0x48] sm:$0xff] }
  0x21   :  { %710 = vmatprep.subr.bf16.mxu0 %v150_v52  ;;  %1641 = vmatprep.subr.bf16.mxu1 %v150_v52  ;;  %v281_v33 = vld [vmem:[%s3536_s2 + $0x3f0] sm:$0xff]  ;;  %v166_v35 = vld [vmem:[%s3536_s2 + $0x58] sm:$0xff]  ;;  %v284_v36 = vld [vmem:[%s3536_s2 + $0x408] sm:$0xff]  ;;  %v397_v38 = vpack.c.bf16 %v161_v31, %v159_v30 }
  0x22   :  { %v286_v37 = vld [vmem:[%s3536_s2 + $0x418] sm:$0xff]  ;;  %v457_v39 = vpack.c.bf16 %v281_v33, %v279_v32  ;;  %v400_v40 = vpack.c.bf16 %v166_v35, %v164_v34  ;;  %v163_v42 = vld [vmem:[%s3536_s2 + $0x40] sm:$0xff]  ;;  %v165_v43 = vld [vmem:[%s3536_s2 + $0x50] sm:$0xff] }
  0x23   :  { %v460_v41 = vpack.c.bf16 %v286_v37, %v284_v36  ;;  %v283_v44 = vld [vmem:[%s3536_s2 + $0x400] sm:$0xff]  ;;  %v285_v45 = vld [vmem:[%s3536_s2 + $0x410] sm:$0xff]  ;;  %v168_v46 = vld [vmem:[%s3536_s2 + $0x68] sm:$0xff]  ;;  %v399_v50 = vpack.c.bf16 %v165_v43, %v163_v42 }
  0x24   :  { %711 = vmatpush1.bf16.msra.mxu0 %v149_v3  ;;  %1651 = vmatpush1.bf16.msra.mxu1 %v149_v3  ;;  %v170_v47 = vld [vmem:[%s3536_s2 + $0x78] sm:$0xff]  ;;  %v288_v48 = vld [vmem:[%s3536_s2 + $0x428] sm:$0xff]  ;;  %v459_v51 = vpack.c.bf16 %v285_v45, %v283_v44  ;;  %v167_v54 = vld [vmem:[%s3536_s2 + $0x60] sm:$0xff] }
  0x25   :  { %712 = vmatprep.subr.bf16.mxu0 %v152_v7  ;;  %1642 = vmatprep.subr.bf16.mxu1 %v152_v7  ;;  %v290_v49 = vld [vmem:[%s3536_s2 + $0x438] sm:$0xff]  ;;  %v402_v52 = vpack.c.bf16 %v170_v47, %v168_v46  ;;  %v169_v55 = vld [vmem:[%s3536_s2 + $0x70] sm:$0xff]  ;;  %v287_v56 = vld [vmem:[%s3536_s2 + $0x420] sm:$0xff] }
  0x26   :  { %v462_v53 = vpack.c.bf16 %v290_v49, %v288_v48  ;;  %v289_v57 = vld [vmem:[%s3536_s2 + $0x430] sm:$0xff]  ;;  %v172_v58 = vld [vmem:[%s3536_s2 + $0x88] sm:$0xff]  ;;  %v174_v59 = vld [vmem:[%s3536_s2 + $0x98] sm:$0xff]  ;;  %v401_v62 = vpack.c.bf16 %v169_v55, %v167_v54 }
  0x27   :  { %v292_v60 = vld [vmem:[%s3536_s2 + $0x448] sm:$0xff]  ;;  %v294_v61 = vld [vmem:[%s3536_s2 + $0x458] sm:$0xff]  ;;  %v461_v63 = vpack.c.bf16 %v289_v57, %v287_v56  ;;  %v404_v0 = vpack.c.bf16 %v174_v59, %v172_v58  ;;  %v171_v2 = vld [vmem:[%s3536_s2 + $0x80] sm:$0xff] }
  0x28   :  { %713 = vmatpush1.bf16.msra.mxu0 %v151_v13  ;;  %1652 = vmatpush1.bf16.msra.mxu1 %v151_v13  ;;  %v464_v1 = vpack.c.bf16 %v294_v61, %v292_v60  ;;  %v173_v3 = vld [vmem:[%s3536_s2 + $0x90] sm:$0xff]  ;;  %v291_v4 = vld [vmem:[%s3536_s2 + $0x440] sm:$0xff]  ;;  %v176_v6 = vld [vmem:[%s3536_s2 + $0xa8] sm:$0xff] }
  0x29   :  { %714 = vmatprep.subr.bf16.mxu0 %v154_v16  ;;  %1643 = vmatprep.subr.bf16.mxu1 %v154_v16  ;;  %v293_v5 = vld [vmem:[%s3536_s2 + $0x450] sm:$0xff]  ;;  %v178_v7 = vld [vmem:[%s3536_s2 + $0xb8] sm:$0xff]  ;;  %v296_v8 = vld [vmem:[%s3536_s2 + $0x468] sm:$0xff]  ;;  %v403_v10 = vpack.c.bf16 %v173_v3, %v171_v2 }
  0x2a   :  { %v298_v9 = vld [vmem:[%s3536_s2 + $0x478] sm:$0xff]  ;;  %v463_v11 = vpack.c.bf16 %v293_v5, %v291_v4  ;;  %v406_v12 = vpack.c.bf16 %v178_v7, %v176_v6  ;;  %v175_v14 = vld [vmem:[%s3536_s2 + $0xa0] sm:$0xff]  ;;  %v177_v15 = vld [vmem:[%s3536_s2 + $0xb0] sm:$0xff] }
  0x2b   :  { %v466_v13 = vpack.c.bf16 %v298_v9, %v296_v8  ;;  %v295_v16 = vld [vmem:[%s3536_s2 + $0x460] sm:$0xff]  ;;  %v297_v17 = vld [vmem:[%s3536_s2 + $0x470] sm:$0xff]  ;;  %v180_v18 = vld [vmem:[%s3536_s2 + $0xc8] sm:$0xff]  ;;  %v405_v22 = vpack.c.bf16 %v177_v15, %v175_v14 }
  0x2c   :  { %715 = vmatpush1.bf16.msra.mxu0 %v153_v19  ;;  %1653 = vmatpush1.bf16.msra.mxu1 %v153_v19  ;;  %v182_v19 = vld [vmem:[%s3536_s2 + $0xd8] sm:$0xff]  ;;  %v300_v20 = vld [vmem:[%s3536_s2 + $0x488] sm:$0xff]  ;;  %v465_v23 = vpack.c.bf16 %v297_v17, %v295_v16 }
  0x2d   :  { %v302_v21 = vld [vmem:[%s3536_s2 + $0x498] sm:$0xff]  ;;  %v408_v24 = vpack.c.bf16 %v182_v19, %v180_v18  ;;  %v184_v30 = vld [vmem:[%s3536_s2 + $0xe8] sm:$0xff] }
  0x2e   :  { %v468_v25 = vpack.c.bf16 %v302_v21, %v300_v20  ;;  %v186_v31 = vld [vmem:[%s3536_s2 + $0xf8] sm:$0xff]  ;;  %v304_v32 = vld [vmem:[%s3536_s2 + $0x4a8] sm:$0xff] }
  0x2f   :  { %729 = vmatmul.mubr.bf16.vlgmr.msra.gmra.mrb[0].mxu0 %v395_v26  ;;  %1029 = vmatmul.mubr.bf16.vlgmr.msra.gmra.mrb[0].mxu1 %v455_v27  ;;  %v179_v26 = vld [vmem:[%s3536_s2 + $0xc0] sm:$0xff]  ;;  %v181_v27 = vld [vmem:[%s3536_s2 + $0xd0] sm:$0xff]  ;;  %v306_v33 = vld [vmem:[%s3536_s2 + $0x4b8] sm:$0xff]  ;;  %v410_v36 = vpack.c.bf16 %v186_v31, %v184_v30 }
  0x30   :  { %1575 = vmatprep.mubr.msk.bf16.mxu0 %vm515_vm0, %v398_v28  ;;  %1605 = vmatprep.mubr.msk.bf16.mxu1 %vm515_vm0, %v458_v29  ;;  %v299_v28 = vld [vmem:[%s3536_s2 + $0x480] sm:$0xff]  ;;  %v301_v29 = vld [vmem:[%s3536_s2 + $0x490] sm:$0xff]  ;;  %v407_v34 = vpack.c.bf16 %v181_v27, %v179_v26  ;;  %v470_v37 = vpack.c.bf16 %v306_v33, %v304_v32  ;;  %v188_v42 = vld [vmem:[%s3536_s2 + $0x108] sm:$0xff] }
  0x31   :  { %v467_v35 = vpack.c.bf16 %v301_v29, %v299_v28  ;;  %v190_v43 = vld [vmem:[%s3536_s2 + $0x118] sm:$0xff]  ;;  %v308_v44 = vld [vmem:[%s3536_s2 + $0x4c8] sm:$0xff] }
  0x32   :  { %v310_v45 = vld [vmem:[%s3536_s2 + $0x4d8] sm:$0xff]  ;;  %v412_v48 = vpack.c.bf16 %v190_v43, %v188_v42  ;;  %v192_v54 = vld [vmem:[%s3536_s2 + $0x128] sm:$0xff] }
  0x33   :  { %v472_v49 = vpack.c.bf16 %v310_v45, %v308_v44  ;;  %v194_v55 = vld [vmem:[%s3536_s2 + $0x138] sm:$0xff]  ;;  %v312_v56 = vld [vmem:[%s3536_s2 + $0x4e8] sm:$0xff] }
  0x34   :  { %v314_v57 = vld [vmem:[%s3536_s2 + $0x4f8] sm:$0xff]  ;;  %v414_v60 = vpack.c.bf16 %v194_v55, %v192_v54  ;;  %v196_v2 = vld [vmem:[%s3536_s2 + $0x148] sm:$0xff] }
  0x35   :  { %v474_v61 = vpack.c.bf16 %v314_v57, %v312_v56  ;;  %v198_v3 = vld [vmem:[%s3536_s2 + $0x158] sm:$0xff]  ;;  %v316_v4 = vld [vmem:[%s3536_s2 + $0x508] sm:$0xff] }
  0x36   :  { %v318_v5 = vld [vmem:[%s3536_s2 + $0x518] sm:$0xff]  ;;  %v416_v8 = vpack.c.bf16 %v198_v3, %v196_v2  ;;  %v200_v14 = vld [vmem:[%s3536_s2 + $0x168] sm:$0xff] }
  0x37   :  { %739 = vmatmul.mubr.bf16.gmra.mrb[4].mxu0 %v397_v38  ;;  %1039 = vmatmul.mubr.bf16.gmra.mrb[4].mxu1 %v457_v39  ;;  %v183_v38 = vld [vmem:[%s3536_s2 + $0xe0] sm:$0xff]  ;;  %v185_v39 = vld [vmem:[%s3536_s2 + $0xf0] sm:$0xff]  ;;  %v476_v9 = vpack.c.bf16 %v318_v5, %v316_v4  ;;  %v202_v15 = vld [vmem:[%s3536_s2 + $0x178] sm:$0xff] }
  0x38   :  { %1576 = vmatprep.mubr.msk.bf16.mxu0 %vm515_vm0, %v400_v40  ;;  %1606 = vmatprep.mubr.msk.bf16.mxu1 %vm515_vm0, %v460_v41  ;;  %v303_v40 = vld [vmem:[%s3536_s2 + $0x4a0] sm:$0xff]  ;;  %v305_v41 = vld [vmem:[%s3536_s2 + $0x4b0] sm:$0xff]  ;;  %v409_v46 = vpack.c.bf16 %v185_v39, %v183_v38  ;;  %v320_v16 = vld [vmem:[%s3536_s2 + $0x528] sm:$0xff]  ;;  %v418_v20 = vpack.c.bf16 %v202_v15, %v200_v14 }
  0x39   :  { %v469_v47 = vpack.c.bf16 %v305_v41, %v303_v40  ;;  %v322_v17 = vld [vmem:[%s3536_s2 + $0x538] sm:$0xff]  ;;  %v204_v26 = vld [vmem:[%s3536_s2 + $0x188] sm:$0xff] }
  0x3a   :  { %v478_v21 = vpack.c.bf16 %v322_v17, %v320_v16  ;;  %v206_v27 = vld [vmem:[%s3536_s2 + $0x198] sm:$0xff]  ;;  %v324_v28 = vld [vmem:[%s3536_s2 + $0x548] sm:$0xff] }
  0x3b   :  { %v326_v29 = vld [vmem:[%s3536_s2 + $0x558] sm:$0xff]  ;;  %v420_v32 = vpack.c.bf16 %v206_v27, %v204_v26  ;;  %v208_v38 = vld [vmem:[%s3536_s2 + $0x1a8] sm:$0xff] }
  0x3c   :  { %v480_v33 = vpack.c.bf16 %v326_v29, %v324_v28  ;;  %v210_v39 = vld [vmem:[%s3536_s2 + $0x1b8] sm:$0xff]  ;;  %v328_v40 = vld [vmem:[%s3536_s2 + $0x568] sm:$0xff] }
  0x3d   :  { %v330_v41 = vld [vmem:[%s3536_s2 + $0x578] sm:$0xff]  ;;  %v422_v44 = vpack.c.bf16 %v210_v39, %v208_v38 }
  0x3e   :  { %v482_v45 = vpack.c.bf16 %v330_v41, %v328_v40 }
  0x3f   :  { %749 = vmatmul.mubr.bf16.gmra.mrb[8].mxu0 %v399_v50  ;;  %1049 = vmatmul.mubr.bf16.gmra.mrb[8].mxu1 %v459_v51  ;;  %v187_v50 = vld [vmem:[%s3536_s2 + $0x100] sm:$0xff]  ;;  %v189_v51 = vld [vmem:[%s3536_s2 + $0x110] sm:$0xff] }
  0x40   :  { %1577 = vmatprep.mubr.msk.bf16.mxu0 %vm515_vm0, %v402_v52  ;;  %1607 = vmatprep.mubr.msk.bf16.mxu1 %vm515_vm0, %v462_v53  ;;  %v307_v52 = vld [vmem:[%s3536_s2 + $0x4c0] sm:$0xff]  ;;  %v309_v53 = vld [vmem:[%s3536_s2 + $0x4d0] sm:$0xff]  ;;  %v411_v58 = vpack.c.bf16 %v189_v51, %v187_v50  ;;  %v212_v50 = vld [vmem:[%s3536_s2 + $0x1c8] sm:$0xff] }
  0x41   :  { %v471_v59 = vpack.c.bf16 %v309_v53, %v307_v52  ;;  %v214_v51 = vld [vmem:[%s3536_s2 + $0x1d8] sm:$0xff]  ;;  %v332_v52 = vld [vmem:[%s3536_s2 + $0x588] sm:$0xff] }
  0x42   :  { %v334_v53 = vld [vmem:[%s3536_s2 + $0x598] sm:$0xff]  ;;  %v424_v56 = vpack.c.bf16 %v214_v51, %v212_v50 }
  0x43   :  { %v484_v57 = vpack.c.bf16 %v334_v53, %v332_v52 }
  0x47   :  { %759 = vmatmul.mubr.bf16.gmra.mrb[12].mxu0 %v401_v62  ;;  %1059 = vmatmul.mubr.bf16.gmra.mrb[12].mxu1 %v461_v63  ;;  %v191_v62 = vld [vmem:[%s3536_s2 + $0x120] sm:$0xff]  ;;  %v193_v63 = vld [vmem:[%s3536_s2 + $0x130] sm:$0xff] }
  0x48   :  { %1578 = vmatprep.mubr.msk.bf16.mxu0 %vm515_vm0, %v404_v0  ;;  %1608 = vmatprep.mubr.msk.bf16.mxu1 %vm515_vm0, %v464_v1  ;;  %v311_v0 = vld [vmem:[%s3536_s2 + $0x4e0] sm:$0xff]  ;;  %v313_v1 = vld [vmem:[%s3536_s2 + $0x4f0] sm:$0xff]  ;;  %v413_v6 = vpack.c.bf16 %v193_v63, %v191_v62  ;;  %v216_v62 = vld [vmem:[%s3536_s2 + $0x1e8] sm:$0xff] }
  0x49   :  { %v473_v7 = vpack.c.bf16 %v313_v1, %v311_v0  ;;  %v218_v63 = vld [vmem:[%s3536_s2 + $0x1f8] sm:$0xff]  ;;  %v336_v0 = vld [vmem:[%s3536_s2 + $0x5a8] sm:$0xff] }
  0x4a   :  { %v338_v1 = vld [vmem:[%s3536_s2 + $0x5b8] sm:$0xff]  ;;  %v426_v4 = vpack.c.bf16 %v218_v63, %v216_v62 }
  0x4b   :  { %v486_v5 = vpack.c.bf16 %v338_v1, %v336_v0 }
  0x4f   :  { %769 = vmatmul.mubr.bf16.gmra.mrb[16].mxu0 %v403_v10  ;;  %1069 = vmatmul.mubr.bf16.gmra.mrb[16].mxu1 %v463_v11  ;;  %v195_v10 = vld [vmem:[%s3536_s2 + $0x140] sm:$0xff]  ;;  %v197_v11 = vld [vmem:[%s3536_s2 + $0x150] sm:$0xff] }
  0x50   :  { %1579 = vmatprep.mubr.msk.bf16.mxu0 %vm515_vm0, %v406_v12  ;;  %1609 = vmatprep.mubr.msk.bf16.mxu1 %vm515_vm0, %v466_v13  ;;  %v315_v12 = vld [vmem:[%s3536_s2 + $0x500] sm:$0xff]  ;;  %v317_v13 = vld [vmem:[%s3536_s2 + $0x510] sm:$0xff]  ;;  %v415_v18 = vpack.c.bf16 %v197_v11, %v195_v10  ;;  %v220_v10 = vld [vmem:[%s3536_s2 + $0x208] sm:$0xff] }
  0x51   :  { %v475_v19 = vpack.c.bf16 %v317_v13, %v315_v12  ;;  %v222_v11 = vld [vmem:[%s3536_s2 + $0x218] sm:$0xff]  ;;  %v340_v12 = vld [vmem:[%s3536_s2 + $0x5c8] sm:$0xff] }
  0x52   :  { %v342_v13 = vld [vmem:[%s3536_s2 + $0x5d8] sm:$0xff]  ;;  %v428_v16 = vpack.c.bf16 %v222_v11, %v220_v10 }
  0x53   :  { %v488_v17 = vpack.c.bf16 %v342_v13, %v340_v12 }
  0x57   :  { %779 = vmatmul.mubr.bf16.gmra.mrb[20].mxu0 %v405_v22  ;;  %1079 = vmatmul.mubr.bf16.gmra.mrb[20].mxu1 %v465_v23  ;;  %v199_v22 = vld [vmem:[%s3536_s2 + $0x160] sm:$0xff]  ;;  %v201_v23 = vld [vmem:[%s3536_s2 + $0x170] sm:$0xff] }
  0x58   :  { %1580 = vmatprep.mubr.msk.bf16.mxu0 %vm515_vm0, %v408_v24  ;;  %1610 = vmatprep.mubr.msk.bf16.mxu1 %vm515_vm0, %v468_v25  ;;  %v319_v24 = vld [vmem:[%s3536_s2 + $0x520] sm:$0xff]  ;;  %v321_v25 = vld [vmem:[%s3536_s2 + $0x530] sm:$0xff]  ;;  %v417_v30 = vpack.c.bf16 %v201_v23, %v199_v22  ;;  %v224_v22 = vld [vmem:[%s3536_s2 + $0x228] sm:$0xff] }
  0x59   :  { %v477_v31 = vpack.c.bf16 %v321_v25, %v319_v24  ;;  %v226_v23 = vld [vmem:[%s3536_s2 + $0x238] sm:$0xff]  ;;  %v344_v24 = vld [vmem:[%s3536_s2 + $0x5e8] sm:$0xff] }
  0x5a   :  { %v346_v25 = vld [vmem:[%s3536_s2 + $0x5f8] sm:$0xff]  ;;  %v430_v28 = vpack.c.bf16 %v226_v23, %v224_v22 }
  0x5b   :  { %v490_v29 = vpack.c.bf16 %v346_v25, %v344_v24 }
  0x5f   :  { %789 = vmatmul.mubr.bf16.gmra.mrb[24].mxu0 %v407_v34  ;;  %1089 = vmatmul.mubr.bf16.gmra.mrb[24].mxu1 %v467_v35  ;;  %v203_v34 = vld [vmem:[%s3536_s2 + $0x180] sm:$0xff]  ;;  %v205_v35 = vld [vmem:[%s3536_s2 + $0x190] sm:$0xff] }
  0x60   :  { %1581 = vmatprep.mubr.msk.bf16.mxu0 %vm515_vm0, %v410_v36  ;;  %1611 = vmatprep.mubr.msk.bf16.mxu1 %vm515_vm0, %v470_v37  ;;  %v323_v36 = vld [vmem:[%s3536_s2 + $0x540] sm:$0xff]  ;;  %v325_v37 = vld [vmem:[%s3536_s2 + $0x550] sm:$0xff]  ;;  %v419_v42 = vpack.c.bf16 %v205_v35, %v203_v34  ;;  %v228_v34 = vld [vmem:[%s3536_s2 + $0x248] sm:$0xff] }
  0x61   :  { %v479_v43 = vpack.c.bf16 %v325_v37, %v323_v36  ;;  %v230_v35 = vld [vmem:[%s3536_s2 + $0x258] sm:$0xff]  ;;  %v348_v36 = vld [vmem:[%s3536_s2 + $0x608] sm:$0xff] }
  0x62   :  { %v350_v37 = vld [vmem:[%s3536_s2 + $0x618] sm:$0xff]  ;;  %v432_v40 = vpack.c.bf16 %v230_v35, %v228_v34 }
  0x63   :  { %v492_v41 = vpack.c.bf16 %v350_v37, %v348_v36 }
  0x67   :  { %799 = vmatmul.mubr.bf16.gmra.mrb[28].mxu0 %v409_v46  ;;  %1099 = vmatmul.mubr.bf16.gmra.mrb[28].mxu1 %v469_v47  ;;  %v207_v46 = vld [vmem:[%s3536_s2 + $0x1a0] sm:$0xff]  ;;  %v209_v47 = vld [vmem:[%s3536_s2 + $0x1b0] sm:$0xff] }
  0x68   :  { %1582 = vmatprep.mubr.msk.bf16.mxu0 %vm515_vm0, %v412_v48  ;;  %1612 = vmatprep.mubr.msk.bf16.mxu1 %vm515_vm0, %v472_v49  ;;  %v327_v48 = vld [vmem:[%s3536_s2 + $0x560] sm:$0xff]  ;;  %v329_v49 = vld [vmem:[%s3536_s2 + $0x570] sm:$0xff]  ;;  %v421_v54 = vpack.c.bf16 %v209_v47, %v207_v46  ;;  %v232_v46 = vld [vmem:[%s3536_s2 + $0x268] sm:$0xff] }
  0x69   :  { %v481_v55 = vpack.c.bf16 %v329_v49, %v327_v48  ;;  %v234_v47 = vld [vmem:[%s3536_s2 + $0x278] sm:$0xff]  ;;  %v352_v48 = vld [vmem:[%s3536_s2 + $0x628] sm:$0xff] }
  0x6a   :  { %v354_v49 = vld [vmem:[%s3536_s2 + $0x638] sm:$0xff]  ;;  %v434_v52 = vpack.c.bf16 %v234_v47, %v232_v46 }
  0x6b   :  { %v494_v53 = vpack.c.bf16 %v354_v49, %v352_v48 }
  0x6f   :  { %809 = vmatmul.mubr.bf16.gmra.mrb[32].mxu0 %v411_v58  ;;  %1109 = vmatmul.mubr.bf16.gmra.mrb[32].mxu1 %v471_v59  ;;  %v211_v58 = vld [vmem:[%s3536_s2 + $0x1c0] sm:$0xff]  ;;  %v213_v59 = vld [vmem:[%s3536_s2 + $0x1d0] sm:$0xff] }
  0x70   :  { %1583 = vmatprep.mubr.msk.bf16.mxu0 %vm515_vm0, %v414_v60  ;;  %1613 = vmatprep.mubr.msk.bf16.mxu1 %vm515_vm0, %v474_v61  ;;  %v331_v60 = vld [vmem:[%s3536_s2 + $0x580] sm:$0xff]  ;;  %v333_v61 = vld [vmem:[%s3536_s2 + $0x590] sm:$0xff]  ;;  %v423_v2 = vpack.c.bf16 %v213_v59, %v211_v58  ;;  %v236_v58 = vld [vmem:[%s3536_s2 + $0x288] sm:$0xff] }
  0x71   :  { %v483_v3 = vpack.c.bf16 %v333_v61, %v331_v60  ;;  %v238_v59 = vld [vmem:[%s3536_s2 + $0x298] sm:$0xff]  ;;  %v356_v60 = vld [vmem:[%s3536_s2 + $0x648] sm:$0xff] }
  0x72   :  { %v358_v61 = vld [vmem:[%s3536_s2 + $0x658] sm:$0xff]  ;;  %v436_v0 = vpack.c.bf16 %v238_v59, %v236_v58 }
  0x73   :  { %v496_v1 = vpack.c.bf16 %v358_v61, %v356_v60 }
  0x77   :  { %819 = vmatmul.mubr.bf16.gmra.mrb[36].mxu0 %v413_v6  ;;  %1119 = vmatmul.mubr.bf16.gmra.mrb[36].mxu1 %v473_v7  ;;  %v215_v6 = vld [vmem:[%s3536_s2 + $0x1e0] sm:$0xff]  ;;  %v217_v7 = vld [vmem:[%s3536_s2 + $0x1f0] sm:$0xff] }
  0x78   :  { %1584 = vmatprep.mubr.msk.bf16.mxu0 %vm515_vm0, %v416_v8  ;;  %1614 = vmatprep.mubr.msk.bf16.mxu1 %vm515_vm0, %v476_v9  ;;  %v335_v8 = vld [vmem:[%s3536_s2 + $0x5a0] sm:$0xff]  ;;  %v337_v9 = vld [vmem:[%s3536_s2 + $0x5b0] sm:$0xff]  ;;  %v425_v14 = vpack.c.bf16 %v217_v7, %v215_v6  ;;  %v240_v6 = vld [vmem:[%s3536_s2 + $0x2a8] sm:$0xff] }
  0x79   :  { %v485_v15 = vpack.c.bf16 %v337_v9, %v335_v8  ;;  %v242_v7 = vld [vmem:[%s3536_s2 + $0x2b8] sm:$0xff]  ;;  %v360_v8 = vld [vmem:[%s3536_s2 + $0x668] sm:$0xff] }
  0x7a   :  { %v362_v9 = vld [vmem:[%s3536_s2 + $0x678] sm:$0xff]  ;;  %v438_v12 = vpack.c.bf16 %v242_v7, %v240_v6 }
  0x7b   :  { %v498_v13 = vpack.c.bf16 %v362_v9, %v360_v8 }
  0x7f   :  { %829 = vmatmul.mubr.bf16.gmra.mrb[40].mxu0 %v415_v18  ;;  %1129 = vmatmul.mubr.bf16.gmra.mrb[40].mxu1 %v475_v19  ;;  %v219_v18 = vld [vmem:[%s3536_s2 + $0x200] sm:$0xff]  ;;  %v221_v19 = vld [vmem:[%s3536_s2 + $0x210] sm:$0xff] }
  0x80   :  { %1585 = vmatprep.mubr.msk.bf16.mxu0 %vm515_vm0, %v418_v20  ;;  %1615 = vmatprep.mubr.msk.bf16.mxu1 %vm515_vm0, %v478_v21  ;;  %v339_v20 = vld [vmem:[%s3536_s2 + $0x5c0] sm:$0xff]  ;;  %v341_v21 = vld [vmem:[%s3536_s2 + $0x5d0] sm:$0xff]  ;;  %v427_v26 = vpack.c.bf16 %v221_v19, %v219_v18  ;;  %v244_v18 = vld [vmem:[%s3536_s2 + $0x2c8] sm:$0xff] }
  0x81   :  { %v487_v27 = vpack.c.bf16 %v341_v21, %v339_v20  ;;  %v246_v19 = vld [vmem:[%s3536_s2 + $0x2d8] sm:$0xff]  ;;  %v364_v20 = vld [vmem:[%s3536_s2 + $0x688] sm:$0xff] }
  0x82   :  { %v366_v21 = vld [vmem:[%s3536_s2 + $0x698] sm:$0xff]  ;;  %v440_v24 = vpack.c.bf16 %v246_v19, %v244_v18 }
  0x83   :  { %v500_v25 = vpack.c.bf16 %v366_v21, %v364_v20 }
  0x87   :  { %839 = vmatmul.mubr.bf16.gmra.mrb[44].mxu0 %v417_v30  ;;  %1139 = vmatmul.mubr.bf16.gmra.mrb[44].mxu1 %v477_v31  ;;  %v223_v30 = vld [vmem:[%s3536_s2 + $0x220] sm:$0xff]  ;;  %v225_v31 = vld [vmem:[%s3536_s2 + $0x230] sm:$0xff] }
  0x88   :  { %1586 = vmatprep.mubr.msk.bf16.mxu0 %vm515_vm0, %v420_v32  ;;  %1616 = vmatprep.mubr.msk.bf16.mxu1 %vm515_vm0, %v480_v33  ;;  %v343_v32 = vld [vmem:[%s3536_s2 + $0x5e0] sm:$0xff]  ;;  %v345_v33 = vld [vmem:[%s3536_s2 + $0x5f0] sm:$0xff]  ;;  %v429_v38 = vpack.c.bf16 %v225_v31, %v223_v30  ;;  %v248_v30 = vld [vmem:[%s3536_s2 + $0x2e8] sm:$0xff] }
  0x89   :  { %v489_v39 = vpack.c.bf16 %v345_v33, %v343_v32  ;;  %v250_v31 = vld [vmem:[%s3536_s2 + $0x2f8] sm:$0xff]  ;;  %v368_v32 = vld [vmem:[%s3536_s2 + $0x6a8] sm:$0xff] }
  0x8a   :  { %v370_v33 = vld [vmem:[%s3536_s2 + $0x6b8] sm:$0xff]  ;;  %v442_v36 = vpack.c.bf16 %v250_v31, %v248_v30 }
  0x8b   :  { %v502_v37 = vpack.c.bf16 %v370_v33, %v368_v32 }
  0x8f   :  { %849 = vmatmul.mubr.bf16.gmra.mrb[48].mxu0 %v419_v42  ;;  %1149 = vmatmul.mubr.bf16.gmra.mrb[48].mxu1 %v479_v43  ;;  %v227_v42 = vld [vmem:[%s3536_s2 + $0x240] sm:$0xff]  ;;  %v229_v43 = vld [vmem:[%s3536_s2 + $0x250] sm:$0xff] }
  0x90   :  { %1587 = vmatprep.mubr.msk.bf16.mxu0 %vm515_vm0, %v422_v44  ;;  %1617 = vmatprep.mubr.msk.bf16.mxu1 %vm515_vm0, %v482_v45  ;;  %v347_v44 = vld [vmem:[%s3536_s2 + $0x600] sm:$0xff]  ;;  %v349_v45 = vld [vmem:[%s3536_s2 + $0x610] sm:$0xff]  ;;  %v431_v50 = vpack.c.bf16 %v229_v43, %v227_v42  ;;  %v252_v42 = vld [vmem:[%s3536_s2 + $0x308] sm:$0xff] }
  0x91   :  { %v491_v51 = vpack.c.bf16 %v349_v45, %v347_v44  ;;  %v254_v43 = vld [vmem:[%s3536_s2 + $0x318] sm:$0xff]  ;;  %v372_v44 = vld [vmem:[%s3536_s2 + $0x6c8] sm:$0xff] }
  0x92   :  { %v374_v45 = vld [vmem:[%s3536_s2 + $0x6d8] sm:$0xff]  ;;  %v444_v48 = vpack.c.bf16 %v254_v43, %v252_v42  ;;  %v267_v42 = vld [vmem:[%s3536_s2 + $0x380] sm:$0xff]  ;;  %v269_v43 = vld [vmem:[%s3536_s2 + $0x390] sm:$0xff] }
  0x93   :  { %v504_v49 = vpack.c.bf16 %v374_v45, %v372_v44  ;;  %v387_v44 = vld [vmem:[%s3536_s2 + $0x740] sm:$0xff]  ;;  %v389_v45 = vld [vmem:[%s3536_s2 + $0x750] sm:$0xff] }
  0x97   :  { %859 = vmatmul.mubr.bf16.gmra.mrb[52].mxu0 %v421_v54  ;;  %1159 = vmatmul.mubr.bf16.gmra.mrb[52].mxu1 %v481_v55  ;;  %v231_v54 = vld [vmem:[%s3536_s2 + $0x260] sm:$0xff]  ;;  %v233_v55 = vld [vmem:[%s3536_s2 + $0x270] sm:$0xff] }
  0x98   :  { %1588 = vmatprep.mubr.msk.bf16.mxu0 %vm515_vm0, %v424_v56  ;;  %1618 = vmatprep.mubr.msk.bf16.mxu1 %vm515_vm0, %v484_v57  ;;  %v351_v56 = vld [vmem:[%s3536_s2 + $0x620] sm:$0xff]  ;;  %v353_v57 = vld [vmem:[%s3536_s2 + $0x630] sm:$0xff]  ;;  %v433_v62 = vpack.c.bf16 %v233_v55, %v231_v54  ;;  %v256_v54 = vld [vmem:[%s3536_s2 + $0x328] sm:$0xff] }
  0x99   :  { %v493_v63 = vpack.c.bf16 %v353_v57, %v351_v56  ;;  %v258_v55 = vld [vmem:[%s3536_s2 + $0x338] sm:$0xff]  ;;  %v376_v56 = vld [vmem:[%s3536_s2 + $0x6e8] sm:$0xff] }
  0x9a   :  { %v378_v57 = vld [vmem:[%s3536_s2 + $0x6f8] sm:$0xff]  ;;  %v446_v60 = vpack.c.bf16 %v258_v55, %v256_v54  ;;  %v451_v54 = vpack.c.bf16 %v269_v43, %v267_v42  ;;  %v511_v55 = vpack.c.bf16 %v389_v45, %v387_v44 }
  0x9b   :  { %v506_v61 = vpack.c.bf16 %v378_v57, %v376_v56 }
  0x9f   :  { %869 = vmatmul.mubr.bf16.gmra.mrb[56].mxu0 %v423_v2  ;;  %1169 = vmatmul.mubr.bf16.gmra.mrb[56].mxu1 %v483_v3  ;;  %v235_v2 = vld [vmem:[%s3536_s2 + $0x280] sm:$0xff]  ;;  %v237_v3 = vld [vmem:[%s3536_s2 + $0x290] sm:$0xff] }
  0xa0   :  { %1589 = vmatprep.mubr.msk.bf16.mxu0 %vm515_vm0, %v426_v4  ;;  %1619 = vmatprep.mubr.msk.bf16.mxu1 %vm515_vm0, %v486_v5  ;;  %v355_v4 = vld [vmem:[%s3536_s2 + $0x640] sm:$0xff]  ;;  %v357_v5 = vld [vmem:[%s3536_s2 + $0x650] sm:$0xff]  ;;  %v435_v10 = vpack.c.bf16 %v237_v3, %v235_v2  ;;  %v260_v2 = vld [vmem:[%s3536_s2 + $0x348] sm:$0xff] }
  0xa1   :  { %v495_v11 = vpack.c.bf16 %v357_v5, %v355_v4  ;;  %v262_v3 = vld [vmem:[%s3536_s2 + $0x358] sm:$0xff]  ;;  %v380_v4 = vld [vmem:[%s3536_s2 + $0x708] sm:$0xff] }
  0xa2   :  { %v382_v5 = vld [vmem:[%s3536_s2 + $0x718] sm:$0xff]  ;;  %v448_v8 = vpack.c.bf16 %v262_v3, %v260_v2 }
  0xa3   :  { %v508_v9 = vpack.c.bf16 %v382_v5, %v380_v4 }
  0xa7   :  { %879 = vmatmul.mubr.bf16.gmra.mrb[60].mxu0 %v425_v14  ;;  %1179 = vmatmul.mubr.bf16.gmra.mrb[60].mxu1 %v485_v15  ;;  %v239_v14 = vld [vmem:[%s3536_s2 + $0x2a0] sm:$0xff]  ;;  %v241_v15 = vld [vmem:[%s3536_s2 + $0x2b0] sm:$0xff] }
  0xa8   :  { %1590 = vmatprep.mubr.msk.bf16.mxu0 %vm515_vm0, %v428_v16  ;;  %1620 = vmatprep.mubr.msk.bf16.mxu1 %vm515_vm0, %v488_v17  ;;  %v359_v16 = vld [vmem:[%s3536_s2 + $0x660] sm:$0xff]  ;;  %v361_v17 = vld [vmem:[%s3536_s2 + $0x670] sm:$0xff]  ;;  %v437_v22 = vpack.c.bf16 %v241_v15, %v239_v14  ;;  %v264_v14 = vld [vmem:[%s3536_s2 + $0x368] sm:$0xff] }
  0xa9   :  { %v497_v23 = vpack.c.bf16 %v361_v17, %v359_v16  ;;  %v266_v15 = vld [vmem:[%s3536_s2 + $0x378] sm:$0xff]  ;;  %v384_v16 = vld [vmem:[%s3536_s2 + $0x728] sm:$0xff] }
  0xaa   :  { %v386_v17 = vld [vmem:[%s3536_s2 + $0x738] sm:$0xff]  ;;  %v450_v20 = vpack.c.bf16 %v266_v15, %v264_v14 }
  0xab   :  { %v510_v21 = vpack.c.bf16 %v386_v17, %v384_v16 }
  0xaf   :  { %889 = vmatmul.mubr.bf16.gmra.mrb[64].mxu0 %v427_v26  ;;  %1189 = vmatmul.mubr.bf16.gmra.mrb[64].mxu1 %v487_v27  ;;  %v243_v26 = vld [vmem:[%s3536_s2 + $0x2c0] sm:$0xff]  ;;  %v245_v27 = vld [vmem:[%s3536_s2 + $0x2d0] sm:$0xff] }
  0xb0   :  { %1591 = vmatprep.mubr.msk.bf16.mxu0 %vm515_vm0, %v430_v28  ;;  %1621 = vmatprep.mubr.msk.bf16.mxu1 %vm515_vm0, %v490_v29  ;;  %v363_v28 = vld [vmem:[%s3536_s2 + $0x680] sm:$0xff]  ;;  %v365_v29 = vld [vmem:[%s3536_s2 + $0x690] sm:$0xff]  ;;  %v439_v34 = vpack.c.bf16 %v245_v27, %v243_v26  ;;  %v268_v26 = vld [vmem:[%s3536_s2 + $0x388] sm:$0xff] }
  0xb1   :  { %v499_v35 = vpack.c.bf16 %v365_v29, %v363_v28  ;;  %v270_v27 = vld [vmem:[%s3536_s2 + $0x398] sm:$0xff]  ;;  %v388_v28 = vld [vmem:[%s3536_s2 + $0x748] sm:$0xff] }
  0xb2   :  { %v390_v29 = vld [vmem:[%s3536_s2 + $0x758] sm:$0xff] }
  0xb7   :  { %899 = vmatmul.mubr.bf16.gmra.mrb[68].mxu0 %v429_v38  ;;  %1199 = vmatmul.mubr.bf16.gmra.mrb[68].mxu1 %v489_v39  ;;  %v247_v38 = vld [vmem:[%s3536_s2 + $0x2e0] sm:$0xff]  ;;  %v249_v39 = vld [vmem:[%s3536_s2 + $0x2f0] sm:$0xff] }
  0xb8   :  { %1592 = vmatprep.mubr.msk.bf16.mxu0 %vm515_vm0, %v432_v40  ;;  %1622 = vmatprep.mubr.msk.bf16.mxu1 %vm515_vm0, %v492_v41  ;;  %v367_v40 = vld [vmem:[%s3536_s2 + $0x6a0] sm:$0xff]  ;;  %v369_v41 = vld [vmem:[%s3536_s2 + $0x6b0] sm:$0xff]  ;;  %v441_v46 = vpack.c.bf16 %v249_v39, %v247_v38  ;;  %v452_v38 = vpack.c.bf16 %v270_v27, %v268_v26  ;;  %v512_v39 = vpack.c.bf16 %v390_v29, %v388_v28 }
  0xb9   :  { %v501_v47 = vpack.c.bf16 %v369_v41, %v367_v40 }
  0xbf   :  { %909 = vmatmul.mubr.bf16.gmra.mrb[72].mxu0 %v431_v50  ;;  %1209 = vmatmul.mubr.bf16.gmra.mrb[72].mxu1 %v491_v51  ;;  %v251_v50 = vld [vmem:[%s3536_s2 + $0x300] sm:$0xff]  ;;  %v253_v51 = vld [vmem:[%s3536_s2 + $0x310] sm:$0xff] }
  0xc0   :  { %1593 = vmatprep.mubr.msk.bf16.mxu0 %vm515_vm0, %v434_v52  ;;  %1623 = vmatprep.mubr.msk.bf16.mxu1 %vm515_vm0, %v494_v53  ;;  %v371_v52 = vld [vmem:[%s3536_s2 + $0x6c0] sm:$0xff]  ;;  %v373_v53 = vld [vmem:[%s3536_s2 + $0x6d0] sm:$0xff]  ;;  %v443_v58 = vpack.c.bf16 %v253_v51, %v251_v50 }
  0xc1   :  { %v503_v59 = vpack.c.bf16 %v373_v53, %v371_v52 }
  0xc7   :  { %919 = vmatmul.mubr.bf16.gmra.mrb[76].mxu0 %v433_v62  ;;  %1219 = vmatmul.mubr.bf16.gmra.mrb[76].mxu1 %v493_v63  ;;  %v255_v62 = vld [vmem:[%s3536_s2 + $0x320] sm:$0xff]  ;;  %v257_v63 = vld [vmem:[%s3536_s2 + $0x330] sm:$0xff] }
  0xc8   :  { %1594 = vmatprep.mubr.msk.bf16.mxu0 %vm515_vm0, %v436_v0  ;;  %1624 = vmatprep.mubr.msk.bf16.mxu1 %vm515_vm0, %v496_v1  ;;  %v375_v0 = vld [vmem:[%s3536_s2 + $0x6e0] sm:$0xff]  ;;  %v377_v1 = vld [vmem:[%s3536_s2 + $0x6f0] sm:$0xff]  ;;  %v445_v6 = vpack.c.bf16 %v257_v63, %v255_v62 }
  0xc9   :  { %v505_v7 = vpack.c.bf16 %v377_v1, %v375_v0  ;;  %v271_v62 = vld [vmem:[%s3536_s2 + $0x3a0] sm:$0xff]  ;;  %v273_v63 = vld [vmem:[%s3536_s2 + $0x3b0] sm:$0xff] }
  0xca   :  { %v391_v0 = vld [vmem:[%s3536_s2 + $0x760] sm:$0xff]  ;;  %v393_v1 = vld [vmem:[%s3536_s2 + $0x770] sm:$0xff] }
  0xcf   :  { %929 = vmatmul.mubr.bf16.gmra.mrb[80].mxu0 %v435_v10  ;;  %1229 = vmatmul.mubr.bf16.gmra.mrb[80].mxu1 %v495_v11  ;;  %v259_v10 = vld [vmem:[%s3536_s2 + $0x340] sm:$0xff]  ;;  %v261_v11 = vld [vmem:[%s3536_s2 + $0x350] sm:$0xff] }
  0xd0   :  { %1595 = vmatprep.mubr.msk.bf16.mxu0 %vm515_vm0, %v438_v12  ;;  %1625 = vmatprep.mubr.msk.bf16.mxu1 %vm515_vm0, %v498_v13  ;;  %v379_v12 = vld [vmem:[%s3536_s2 + $0x700] sm:$0xff]  ;;  %v381_v13 = vld [vmem:[%s3536_s2 + $0x710] sm:$0xff]  ;;  %v447_v18 = vpack.c.bf16 %v261_v11, %v259_v10 }
  0xd1   :  { %v507_v19 = vpack.c.bf16 %v381_v13, %v379_v12 }
  0xd7   :  { %939 = vmatmul.mubr.bf16.gmra.mrb[84].mxu0 %v437_v22  ;;  %1239 = vmatmul.mubr.bf16.gmra.mrb[84].mxu1 %v497_v23  ;;  %v263_v22 = vld [vmem:[%s3536_s2 + $0x360] sm:$0xff]  ;;  %v265_v23 = vld [vmem:[%s3536_s2 + $0x370] sm:$0xff] }
  0xd8   :  { %1596 = vmatprep.mubr.msk.bf16.mxu0 %vm515_vm0, %v440_v24  ;;  %1626 = vmatprep.mubr.msk.bf16.mxu1 %vm515_vm0, %v500_v25  ;;  %v383_v24 = vld [vmem:[%s3536_s2 + $0x720] sm:$0xff]  ;;  %v385_v25 = vld [vmem:[%s3536_s2 + $0x730] sm:$0xff] }
  0xdf   :  { %949 = vmatmul.mubr.bf16.gmra.mrb[88].mxu0 %v439_v34  ;;  %1249 = vmatmul.mubr.bf16.gmra.mrb[88].mxu1 %v499_v35  ;;  %v449_v34 = vpack.c.bf16 %v265_v23, %v263_v22  ;;  %v509_v35 = vpack.c.bf16 %v385_v25, %v383_v24 }
  0xe0   :  { %1597 = vmatprep.mubr.msk.bf16.mxu0 %vm515_vm0, %v442_v36  ;;  %1627 = vmatprep.mubr.msk.bf16.mxu1 %vm515_vm0, %v502_v37 }
  0xe7   :  { %959 = vmatmul.mubr.bf16.gmra.mrb[92].mxu0 %v441_v46  ;;  %1259 = vmatmul.mubr.bf16.gmra.mrb[92].mxu1 %v501_v47  ;;  %v272_v46 = vld [vmem:[%s3536_s2 + $0x3a8] sm:$0xff]  ;;  %v274_v47 = vld [vmem:[%s3536_s2 + $0x3b8] sm:$0xff] }
  0xe8   :  { %1598 = vmatprep.mubr.msk.bf16.mxu0 %vm515_vm0, %v444_v48  ;;  %1628 = vmatprep.mubr.msk.bf16.mxu1 %vm515_vm0, %v504_v49  ;;  %v392_v48 = vld [vmem:[%s3536_s2 + $0x768] sm:$0xff]  ;;  %v394_v49 = vld [vmem:[%s3536_s2 + $0x778] sm:$0xff] }
  0xef   :  { %969 = vmatmul.mubr.bf16.gmra.mrb[96].mxu0 %v443_v58  ;;  %1269 = vmatmul.mubr.bf16.gmra.mrb[96].mxu1 %v503_v59  ;;  %v454_v58 = vpack.c.bf16 %v274_v47, %v272_v46  ;;  %v514_v59 = vpack.c.bf16 %v394_v49, %v392_v48 }
  0xf0   :  { %1599 = vmatprep.mubr.msk.bf16.mxu0 %vm515_vm0, %v446_v60  ;;  %1629 = vmatprep.mubr.msk.bf16.mxu1 %vm515_vm0, %v506_v61 }
  0xf7   :  { %979 = vmatmul.mubr.bf16.gmra.mrb[100].mxu0 %v445_v6  ;;  %1279 = vmatmul.mubr.bf16.gmra.mrb[100].mxu1 %v505_v7  ;;  %v453_v6 = vpack.c.bf16 %v273_v63, %v271_v62  ;;  %v513_v7 = vpack.c.bf16 %v393_v1, %v391_v0 }
  0xf8   :  { %1600 = vmatprep.mubr.msk.bf16.mxu0 %vm515_vm0, %v448_v8  ;;  %1630 = vmatprep.mubr.msk.bf16.mxu1 %vm515_vm0, %v508_v9 }
  0xff   :  { %989 = vmatmul.mubr.bf16.gmra.mrb[104].mxu0 %v447_v18  ;;  %1289 = vmatmul.mubr.bf16.gmra.mrb[104].mxu1 %v507_v19 }
 0x100   :  { %1601 = vmatprep.mubr.msk.bf16.mxu0 %vm515_vm0, %v450_v20  ;;  %1631 = vmatprep.mubr.msk.bf16.mxu1 %vm515_vm0, %v510_v21 }
 0x102   :  { %v730_v30 = vpop.f32.mrb[0].mxu0  ;;  %v1030_v31 = vpop.f32.mrb[0].mxu1 }
 0x103   :  { %1329 = vst [vmem:[%s3537_s3] sm:$0xff] %v730_v30  ;;  %1450 = vst [vmem:[%s3537_s3 + $0x3c0] sm:$0xff] %v1030_v31  ;;  %v732_v32 = vpop.f32.mrb[1].mxu0  ;;  %v1032_v33 = vpop.f32.mrb[1].mxu1 }
 0x104   :  { %1331 = vst.msk [vmem:[%s3537_s3 + $0x8] sm:$0xff] %vm1330_vm1, %v732_v32  ;;  %1451 = vst.msk [vmem:[%s3537_s3 + $0x3c8] sm:$0xff] %vm1330_vm1, %v1032_v33  ;;  %v734_v36 = vpop.f32.mrb[2].mxu0  ;;  %v1034_v37 = vpop.f32.mrb[2].mxu1 }
 0x105   :  { %1332 = vst [vmem:[%s3537_s3 + $0x10] sm:$0xff] %v734_v36  ;;  %1452 = vst [vmem:[%s3537_s3 + $0x3d0] sm:$0xff] %v1034_v37  ;;  %v736_v40 = vpop.f32.mrb[3].mxu0  ;;  %v1036_v41 = vpop.f32.mrb[3].mxu1 }
 0x106   :  { %1333 = vst.msk [vmem:[%s3537_s3 + $0x18] sm:$0xff] %vm1330_vm1, %v736_v40  ;;  %1453 = vst.msk [vmem:[%s3537_s3 + $0x3d8] sm:$0xff] %vm1330_vm1, %v1036_v41 }
 0x107   :  { %999 = vmatmul.mubr.bf16.gmra.mrb[108].mxu0 %v449_v34  ;;  %1299 = vmatmul.mubr.bf16.gmra.mrb[108].mxu1 %v509_v35 }
 0x108   :  { %1602 = vmatprep.mubr.msk.bf16.mxu0 %vm515_vm0, %v452_v38  ;;  %1632 = vmatprep.mubr.msk.bf16.mxu1 %vm515_vm0, %v512_v39 }
 0x10a   :  { %v740_v50 = vpop.f32.mrb[4].mxu0  ;;  %v1040_v51 = vpop.f32.mrb[4].mxu1 }
 0x10b   :  { %1334 = vst [vmem:[%s3537_s3 + $0x20] sm:$0xff] %v740_v50  ;;  %1454 = vst [vmem:[%s3537_s3 + $0x3e0] sm:$0xff] %v1040_v51  ;;  %v742_v52 = vpop.f32.mrb[5].mxu0  ;;  %v1042_v53 = vpop.f32.mrb[5].mxu1 }
 0x10c   :  { %1335 = vst.msk [vmem:[%s3537_s3 + $0x28] sm:$0xff] %vm1330_vm1, %v742_v52  ;;  %1455 = vst.msk [vmem:[%s3537_s3 + $0x3e8] sm:$0xff] %vm1330_vm1, %v1042_v53  ;;  %v744_v56 = vpop.f32.mrb[6].mxu0  ;;  %v1044_v57 = vpop.f32.mrb[6].mxu1 }
 0x10d   :  { %1336 = vst [vmem:[%s3537_s3 + $0x30] sm:$0xff] %v744_v56  ;;  %1456 = vst [vmem:[%s3537_s3 + $0x3f0] sm:$0xff] %v1044_v57  ;;  %v746_v60 = vpop.f32.mrb[7].mxu0  ;;  %v1046_v61 = vpop.f32.mrb[7].mxu1 }
 0x10e   :  { %1337 = vst.msk [vmem:[%s3537_s3 + $0x38] sm:$0xff] %vm1330_vm1, %v746_v60  ;;  %1457 = vst.msk [vmem:[%s3537_s3 + $0x3f8] sm:$0xff] %vm1330_vm1, %v1046_v61 }
 0x10f   :  { %1009 = vmatmul.mubr.bf16.gmra.mrb[112].mxu0 %v451_v54  ;;  %1309 = vmatmul.mubr.bf16.gmra.mrb[112].mxu1 %v511_v55 }
 0x110   :  { %1603 = vmatprep.mubr.msk.bf16.mxu0 %vm515_vm0, %v454_v58  ;;  %1633 = vmatprep.mubr.msk.bf16.mxu1 %vm515_vm0, %v514_v59 }
 0x112   :  { %v750_v2 = vpop.f32.mrb[8].mxu0  ;;  %v1050_v3 = vpop.f32.mrb[8].mxu1 }
 0x113   :  { %1338 = vst [vmem:[%s3537_s3 + $0x40] sm:$0xff] %v750_v2  ;;  %1458 = vst [vmem:[%s3537_s3 + $0x400] sm:$0xff] %v1050_v3  ;;  %v752_v4 = vpop.f32.mrb[9].mxu0  ;;  %v1052_v5 = vpop.f32.mrb[9].mxu1 }
 0x114   :  { %1339 = vst.msk [vmem:[%s3537_s3 + $0x48] sm:$0xff] %vm1330_vm1, %v752_v4  ;;  %1459 = vst.msk [vmem:[%s3537_s3 + $0x408] sm:$0xff] %vm1330_vm1, %v1052_v5  ;;  %v754_v8 = vpop.f32.mrb[10].mxu0  ;;  %v1054_v9 = vpop.f32.mrb[10].mxu1 }
 0x115   :  { %1340 = vst [vmem:[%s3537_s3 + $0x50] sm:$0xff] %v754_v8  ;;  %1460 = vst [vmem:[%s3537_s3 + $0x410] sm:$0xff] %v1054_v9  ;;  %v756_v10 = vpop.f32.mrb[11].mxu0  ;;  %v1056_v11 = vpop.f32.mrb[11].mxu1 }
 0x116   :  { %1341 = vst.msk [vmem:[%s3537_s3 + $0x58] sm:$0xff] %vm1330_vm1, %v756_v10  ;;  %1461 = vst.msk [vmem:[%s3537_s3 + $0x418] sm:$0xff] %vm1330_vm1, %v1056_v11 }
 0x117   :  { %1019 = vmatmul.mubr.bf16.gmra.mrb[116].mxu0 %v453_v6  ;;  %1319 = vmatmul.mubr.bf16.gmra.mrb[116].mxu1 %v513_v7 }
 0x11a   :  { %v760_v12 = vpop.f32.mrb[12].mxu0  ;;  %v1060_v13 = vpop.f32.mrb[12].mxu1 }
 0x11b   :  { %1342 = vst [vmem:[%s3537_s3 + $0x60] sm:$0xff] %v760_v12  ;;  %1462 = vst [vmem:[%s3537_s3 + $0x420] sm:$0xff] %v1060_v13  ;;  %v762_v14 = vpop.f32.mrb[13].mxu0  ;;  %v1062_v15 = vpop.f32.mrb[13].mxu1 }
 0x11c   :  { %1343 = vst.msk [vmem:[%s3537_s3 + $0x68] sm:$0xff] %vm1330_vm1, %v762_v14  ;;  %1463 = vst.msk [vmem:[%s3537_s3 + $0x428] sm:$0xff] %vm1330_vm1, %v1062_v15  ;;  %v764_v16 = vpop.f32.mrb[14].mxu0  ;;  %v1064_v17 = vpop.f32.mrb[14].mxu1 }
 0x11d   :  { %1344 = vst [vmem:[%s3537_s3 + $0x70] sm:$0xff] %v764_v16  ;;  %1464 = vst [vmem:[%s3537_s3 + $0x430] sm:$0xff] %v1064_v17  ;;  %v766_v18 = vpop.f32.mrb[15].mxu0  ;;  %v1066_v19 = vpop.f32.mrb[15].mxu1 }
 0x11e   :  { %1345 = vst.msk [vmem:[%s3537_s3 + $0x78] sm:$0xff] %vm1330_vm1, %v766_v18  ;;  %1465 = vst.msk [vmem:[%s3537_s3 + $0x438] sm:$0xff] %vm1330_vm1, %v1066_v19 }
 0x122   :  { %v770_v20 = vpop.f32.mrb[16].mxu0  ;;  %v1070_v21 = vpop.f32.mrb[16].mxu1 }
 0x123   :  { %1346 = vst [vmem:[%s3537_s3 + $0x80] sm:$0xff] %v770_v20  ;;  %1466 = vst [vmem:[%s3537_s3 + $0x440] sm:$0xff] %v1070_v21  ;;  %v772_v22 = vpop.f32.mrb[17].mxu0  ;;  %v1072_v23 = vpop.f32.mrb[17].mxu1 }
 0x124   :  { %1347 = vst.msk [vmem:[%s3537_s3 + $0x88] sm:$0xff] %vm1330_vm1, %v772_v22  ;;  %1467 = vst.msk [vmem:[%s3537_s3 + $0x448] sm:$0xff] %vm1330_vm1, %v1072_v23  ;;  %v774_v24 = vpop.f32.mrb[18].mxu0  ;;  %v1074_v25 = vpop.f32.mrb[18].mxu1 }
 0x125   :  { %1348 = vst [vmem:[%s3537_s3 + $0x90] sm:$0xff] %v774_v24  ;;  %1468 = vst [vmem:[%s3537_s3 + $0x450] sm:$0xff] %v1074_v25  ;;  %v776_v26 = vpop.f32.mrb[19].mxu0  ;;  %v1076_v27 = vpop.f32.mrb[19].mxu1 }
 0x126   :  { %1349 = vst.msk [vmem:[%s3537_s3 + $0x98] sm:$0xff] %vm1330_vm1, %v776_v26  ;;  %1469 = vst.msk [vmem:[%s3537_s3 + $0x458] sm:$0xff] %vm1330_vm1, %v1076_v27 }
 0x12a   :  { %v780_v28 = vpop.f32.mrb[20].mxu0  ;;  %v1080_v29 = vpop.f32.mrb[20].mxu1 }
 0x12b   :  { %1350 = vst [vmem:[%s3537_s3 + $0xa0] sm:$0xff] %v780_v28  ;;  %1470 = vst [vmem:[%s3537_s3 + $0x460] sm:$0xff] %v1080_v29  ;;  %v782_v30 = vpop.f32.mrb[21].mxu0  ;;  %v1082_v31 = vpop.f32.mrb[21].mxu1 }
 0x12c   :  { %1351 = vst.msk [vmem:[%s3537_s3 + $0xa8] sm:$0xff] %vm1330_vm1, %v782_v30  ;;  %1471 = vst.msk [vmem:[%s3537_s3 + $0x468] sm:$0xff] %vm1330_vm1, %v1082_v31  ;;  %v784_v32 = vpop.f32.mrb[22].mxu0  ;;  %v1084_v33 = vpop.f32.mrb[22].mxu1 }
 0x12d   :  { %1352 = vst [vmem:[%s3537_s3 + $0xb0] sm:$0xff] %v784_v32  ;;  %1472 = vst [vmem:[%s3537_s3 + $0x470] sm:$0xff] %v1084_v33  ;;  %v786_v34 = vpop.f32.mrb[23].mxu0  ;;  %v1086_v35 = vpop.f32.mrb[23].mxu1 }
 0x12e   :  { %1353 = vst.msk [vmem:[%s3537_s3 + $0xb8] sm:$0xff] %vm1330_vm1, %v786_v34  ;;  %1473 = vst.msk [vmem:[%s3537_s3 + $0x478] sm:$0xff] %vm1330_vm1, %v1086_v35 }
 0x132   :  { %v790_v36 = vpop.f32.mrb[24].mxu0  ;;  %v1090_v37 = vpop.f32.mrb[24].mxu1 }
 0x133   :  { %1354 = vst [vmem:[%s3537_s3 + $0xc0] sm:$0xff] %v790_v36  ;;  %1474 = vst [vmem:[%s3537_s3 + $0x480] sm:$0xff] %v1090_v37  ;;  %v792_v38 = vpop.f32.mrb[25].mxu0  ;;  %v1092_v39 = vpop.f32.mrb[25].mxu1 }
 0x134   :  { %1355 = vst.msk [vmem:[%s3537_s3 + $0xc8] sm:$0xff] %vm1330_vm1, %v792_v38  ;;  %1475 = vst.msk [vmem:[%s3537_s3 + $0x488] sm:$0xff] %vm1330_vm1, %v1092_v39  ;;  %v794_v40 = vpop.f32.mrb[26].mxu0  ;;  %v1094_v41 = vpop.f32.mrb[26].mxu1 }
 0x135   :  { %1356 = vst [vmem:[%s3537_s3 + $0xd0] sm:$0xff] %v794_v40  ;;  %1476 = vst [vmem:[%s3537_s3 + $0x490] sm:$0xff] %v1094_v41  ;;  %v796_v42 = vpop.f32.mrb[27].mxu0  ;;  %v1096_v43 = vpop.f32.mrb[27].mxu1 }
 0x136   :  { %1357 = vst.msk [vmem:[%s3537_s3 + $0xd8] sm:$0xff] %vm1330_vm1, %v796_v42  ;;  %1477 = vst.msk [vmem:[%s3537_s3 + $0x498] sm:$0xff] %vm1330_vm1, %v1096_v43 }
 0x13a   :  { %v800_v44 = vpop.f32.mrb[28].mxu0  ;;  %v1100_v45 = vpop.f32.mrb[28].mxu1 }
 0x13b   :  { %1358 = vst [vmem:[%s3537_s3 + $0xe0] sm:$0xff] %v800_v44  ;;  %1478 = vst [vmem:[%s3537_s3 + $0x4a0] sm:$0xff] %v1100_v45  ;;  %v802_v46 = vpop.f32.mrb[29].mxu0  ;;  %v1102_v47 = vpop.f32.mrb[29].mxu1 }
 0x13c   :  { %1359 = vst.msk [vmem:[%s3537_s3 + $0xe8] sm:$0xff] %vm1330_vm1, %v802_v46  ;;  %1479 = vst.msk [vmem:[%s3537_s3 + $0x4a8] sm:$0xff] %vm1330_vm1, %v1102_v47  ;;  %v804_v48 = vpop.f32.mrb[30].mxu0  ;;  %v1104_v49 = vpop.f32.mrb[30].mxu1 }
 0x13d   :  { %1360 = vst [vmem:[%s3537_s3 + $0xf0] sm:$0xff] %v804_v48  ;;  %1480 = vst [vmem:[%s3537_s3 + $0x4b0] sm:$0xff] %v1104_v49  ;;  %v806_v50 = vpop.f32.mrb[31].mxu0  ;;  %v1106_v51 = vpop.f32.mrb[31].mxu1 }
 0x13e   :  { %1361 = vst.msk [vmem:[%s3537_s3 + $0xf8] sm:$0xff] %vm1330_vm1, %v806_v50  ;;  %1481 = vst.msk [vmem:[%s3537_s3 + $0x4b8] sm:$0xff] %vm1330_vm1, %v1106_v51 }
 0x142   :  { %v810_v52 = vpop.f32.mrb[32].mxu0  ;;  %v1110_v53 = vpop.f32.mrb[32].mxu1 }
 0x143   :  { %1362 = vst [vmem:[%s3537_s3 + $0x100] sm:$0xff] %v810_v52  ;;  %1482 = vst [vmem:[%s3537_s3 + $0x4c0] sm:$0xff] %v1110_v53  ;;  %v812_v54 = vpop.f32.mrb[33].mxu0  ;;  %v1112_v55 = vpop.f32.mrb[33].mxu1 }
 0x144   :  { %1363 = vst.msk [vmem:[%s3537_s3 + $0x108] sm:$0xff] %vm1330_vm1, %v812_v54  ;;  %1483 = vst.msk [vmem:[%s3537_s3 + $0x4c8] sm:$0xff] %vm1330_vm1, %v1112_v55  ;;  %v814_v56 = vpop.f32.mrb[34].mxu0  ;;  %v1114_v57 = vpop.f32.mrb[34].mxu1 }
 0x145   :  { %1364 = vst [vmem:[%s3537_s3 + $0x110] sm:$0xff] %v814_v56  ;;  %1484 = vst [vmem:[%s3537_s3 + $0x4d0] sm:$0xff] %v1114_v57  ;;  %v816_v58 = vpop.f32.mrb[35].mxu0  ;;  %v1116_v59 = vpop.f32.mrb[35].mxu1 }
 0x146   :  { %1365 = vst.msk [vmem:[%s3537_s3 + $0x118] sm:$0xff] %vm1330_vm1, %v816_v58  ;;  %1485 = vst.msk [vmem:[%s3537_s3 + $0x4d8] sm:$0xff] %vm1330_vm1, %v1116_v59 }
 0x14a   :  { %v820_v60 = vpop.f32.mrb[36].mxu0  ;;  %v1120_v61 = vpop.f32.mrb[36].mxu1 }
 0x14b   :  { %1366 = vst [vmem:[%s3537_s3 + $0x120] sm:$0xff] %v820_v60  ;;  %1486 = vst [vmem:[%s3537_s3 + $0x4e0] sm:$0xff] %v1120_v61  ;;  %v822_v62 = vpop.f32.mrb[37].mxu0  ;;  %v1122_v63 = vpop.f32.mrb[37].mxu1 }
 0x14c   :  { %1367 = vst.msk [vmem:[%s3537_s3 + $0x128] sm:$0xff] %vm1330_vm1, %v822_v62  ;;  %1487 = vst.msk [vmem:[%s3537_s3 + $0x4e8] sm:$0xff] %vm1330_vm1, %v1122_v63  ;;  %v824_v0 = vpop.f32.mrb[38].mxu0  ;;  %v1124_v1 = vpop.f32.mrb[38].mxu1 }
 0x14d   :  { %1368 = vst [vmem:[%s3537_s3 + $0x130] sm:$0xff] %v824_v0  ;;  %1488 = vst [vmem:[%s3537_s3 + $0x4f0] sm:$0xff] %v1124_v1  ;;  %v826_v2 = vpop.f32.mrb[39].mxu0  ;;  %v1126_v3 = vpop.f32.mrb[39].mxu1 }
 0x14e   :  { %1369 = vst.msk [vmem:[%s3537_s3 + $0x138] sm:$0xff] %vm1330_vm1, %v826_v2  ;;  %1489 = vst.msk [vmem:[%s3537_s3 + $0x4f8] sm:$0xff] %vm1330_vm1, %v1126_v3 }
 0x152   :  { %v830_v4 = vpop.f32.mrb[40].mxu0  ;;  %v1130_v5 = vpop.f32.mrb[40].mxu1 }
 0x153   :  { %1370 = vst [vmem:[%s3537_s3 + $0x140] sm:$0xff] %v830_v4  ;;  %1490 = vst [vmem:[%s3537_s3 + $0x500] sm:$0xff] %v1130_v5  ;;  %v832_v6 = vpop.f32.mrb[41].mxu0  ;;  %v1132_v7 = vpop.f32.mrb[41].mxu1 }
 0x154   :  { %1371 = vst.msk [vmem:[%s3537_s3 + $0x148] sm:$0xff] %vm1330_vm1, %v832_v6  ;;  %1491 = vst.msk [vmem:[%s3537_s3 + $0x508] sm:$0xff] %vm1330_vm1, %v1132_v7  ;;  %v834_v8 = vpop.f32.mrb[42].mxu0  ;;  %v1134_v9 = vpop.f32.mrb[42].mxu1 }
 0x155   :  { %1372 = vst [vmem:[%s3537_s3 + $0x150] sm:$0xff] %v834_v8  ;;  %1492 = vst [vmem:[%s3537_s3 + $0x510] sm:$0xff] %v1134_v9  ;;  %v836_v10 = vpop.f32.mrb[43].mxu0  ;;  %v1136_v11 = vpop.f32.mrb[43].mxu1 }
 0x156   :  { %1373 = vst.msk [vmem:[%s3537_s3 + $0x158] sm:$0xff] %vm1330_vm1, %v836_v10  ;;  %1493 = vst.msk [vmem:[%s3537_s3 + $0x518] sm:$0xff] %vm1330_vm1, %v1136_v11 }
 0x15a   :  { %v840_v12 = vpop.f32.mrb[44].mxu0  ;;  %v1140_v13 = vpop.f32.mrb[44].mxu1 }
 0x15b   :  { %1374 = vst [vmem:[%s3537_s3 + $0x160] sm:$0xff] %v840_v12  ;;  %1494 = vst [vmem:[%s3537_s3 + $0x520] sm:$0xff] %v1140_v13  ;;  %v842_v14 = vpop.f32.mrb[45].mxu0  ;;  %v1142_v15 = vpop.f32.mrb[45].mxu1 }
 0x15c   :  { %1375 = vst.msk [vmem:[%s3537_s3 + $0x168] sm:$0xff] %vm1330_vm1, %v842_v14  ;;  %1495 = vst.msk [vmem:[%s3537_s3 + $0x528] sm:$0xff] %vm1330_vm1, %v1142_v15  ;;  %v844_v16 = vpop.f32.mrb[46].mxu0  ;;  %v1144_v17 = vpop.f32.mrb[46].mxu1 }
 0x15d   :  { %1376 = vst [vmem:[%s3537_s3 + $0x170] sm:$0xff] %v844_v16  ;;  %1496 = vst [vmem:[%s3537_s3 + $0x530] sm:$0xff] %v1144_v17  ;;  %v846_v18 = vpop.f32.mrb[47].mxu0  ;;  %v1146_v19 = vpop.f32.mrb[47].mxu1 }
 0x15e   :  { %1377 = vst.msk [vmem:[%s3537_s3 + $0x178] sm:$0xff] %vm1330_vm1, %v846_v18  ;;  %1497 = vst.msk [vmem:[%s3537_s3 + $0x538] sm:$0xff] %vm1330_vm1, %v1146_v19 }
 0x162   :  { %v850_v20 = vpop.f32.mrb[48].mxu0  ;;  %v1150_v21 = vpop.f32.mrb[48].mxu1 }
 0x163   :  { %1378 = vst [vmem:[%s3537_s3 + $0x180] sm:$0xff] %v850_v20  ;;  %1498 = vst [vmem:[%s3537_s3 + $0x540] sm:$0xff] %v1150_v21  ;;  %v852_v22 = vpop.f32.mrb[49].mxu0  ;;  %v1152_v23 = vpop.f32.mrb[49].mxu1 }
 0x164   :  { %1379 = vst.msk [vmem:[%s3537_s3 + $0x188] sm:$0xff] %vm1330_vm1, %v852_v22  ;;  %1499 = vst.msk [vmem:[%s3537_s3 + $0x548] sm:$0xff] %vm1330_vm1, %v1152_v23  ;;  %v854_v24 = vpop.f32.mrb[50].mxu0  ;;  %v1154_v25 = vpop.f32.mrb[50].mxu1 }
 0x165   :  { %1380 = vst [vmem:[%s3537_s3 + $0x190] sm:$0xff] %v854_v24  ;;  %1500 = vst [vmem:[%s3537_s3 + $0x550] sm:$0xff] %v1154_v25  ;;  %v856_v26 = vpop.f32.mrb[51].mxu0  ;;  %v1156_v27 = vpop.f32.mrb[51].mxu1 }
 0x166   :  { %1381 = vst.msk [vmem:[%s3537_s3 + $0x198] sm:$0xff] %vm1330_vm1, %v856_v26  ;;  %1501 = vst.msk [vmem:[%s3537_s3 + $0x558] sm:$0xff] %vm1330_vm1, %v1156_v27 }
 0x16a   :  { %v860_v28 = vpop.f32.mrb[52].mxu0  ;;  %v1160_v29 = vpop.f32.mrb[52].mxu1 }
 0x16b   :  { %1382 = vst [vmem:[%s3537_s3 + $0x1a0] sm:$0xff] %v860_v28  ;;  %1502 = vst [vmem:[%s3537_s3 + $0x560] sm:$0xff] %v1160_v29  ;;  %v862_v30 = vpop.f32.mrb[53].mxu0  ;;  %v1162_v31 = vpop.f32.mrb[53].mxu1 }
 0x16c   :  { %1383 = vst.msk [vmem:[%s3537_s3 + $0x1a8] sm:$0xff] %vm1330_vm1, %v862_v30  ;;  %1503 = vst.msk [vmem:[%s3537_s3 + $0x568] sm:$0xff] %vm1330_vm1, %v1162_v31  ;;  %v864_v32 = vpop.f32.mrb[54].mxu0  ;;  %v1164_v33 = vpop.f32.mrb[54].mxu1 }
 0x16d   :  { %1384 = vst [vmem:[%s3537_s3 + $0x1b0] sm:$0xff] %v864_v32  ;;  %1504 = vst [vmem:[%s3537_s3 + $0x570] sm:$0xff] %v1164_v33  ;;  %v866_v34 = vpop.f32.mrb[55].mxu0  ;;  %v1166_v35 = vpop.f32.mrb[55].mxu1 }
 0x16e   :  { %1385 = vst.msk [vmem:[%s3537_s3 + $0x1b8] sm:$0xff] %vm1330_vm1, %v866_v34  ;;  %1505 = vst.msk [vmem:[%s3537_s3 + $0x578] sm:$0xff] %vm1330_vm1, %v1166_v35 }
 0x172   :  { %v870_v36 = vpop.f32.mrb[56].mxu0  ;;  %v1170_v37 = vpop.f32.mrb[56].mxu1 }
 0x173   :  { %1386 = vst [vmem:[%s3537_s3 + $0x1c0] sm:$0xff] %v870_v36  ;;  %1506 = vst [vmem:[%s3537_s3 + $0x580] sm:$0xff] %v1170_v37  ;;  %v872_v38 = vpop.f32.mrb[57].mxu0  ;;  %v1172_v39 = vpop.f32.mrb[57].mxu1 }
 0x174   :  { %1387 = vst.msk [vmem:[%s3537_s3 + $0x1c8] sm:$0xff] %vm1330_vm1, %v872_v38  ;;  %1507 = vst.msk [vmem:[%s3537_s3 + $0x588] sm:$0xff] %vm1330_vm1, %v1172_v39  ;;  %v874_v40 = vpop.f32.mrb[58].mxu0  ;;  %v1174_v41 = vpop.f32.mrb[58].mxu1 }
 0x175   :  { %1388 = vst [vmem:[%s3537_s3 + $0x1d0] sm:$0xff] %v874_v40  ;;  %1508 = vst [vmem:[%s3537_s3 + $0x590] sm:$0xff] %v1174_v41  ;;  %v876_v42 = vpop.f32.mrb[59].mxu0  ;;  %v1176_v43 = vpop.f32.mrb[59].mxu1 }
 0x176   :  { %1389 = vst.msk [vmem:[%s3537_s3 + $0x1d8] sm:$0xff] %vm1330_vm1, %v876_v42  ;;  %1509 = vst.msk [vmem:[%s3537_s3 + $0x598] sm:$0xff] %vm1330_vm1, %v1176_v43 }
 0x17a   :  { %v880_v44 = vpop.f32.mrb[60].mxu0  ;;  %v1180_v45 = vpop.f32.mrb[60].mxu1 }
 0x17b   :  { %1390 = vst [vmem:[%s3537_s3 + $0x1e0] sm:$0xff] %v880_v44  ;;  %1510 = vst [vmem:[%s3537_s3 + $0x5a0] sm:$0xff] %v1180_v45  ;;  %v882_v46 = vpop.f32.mrb[61].mxu0  ;;  %v1182_v47 = vpop.f32.mrb[61].mxu1 }
 0x17c   :  { %1391 = vst.msk [vmem:[%s3537_s3 + $0x1e8] sm:$0xff] %vm1330_vm1, %v882_v46  ;;  %1511 = vst.msk [vmem:[%s3537_s3 + $0x5a8] sm:$0xff] %vm1330_vm1, %v1182_v47  ;;  %v884_v48 = vpop.f32.mrb[62].mxu0  ;;  %v1184_v49 = vpop.f32.mrb[62].mxu1 }
 0x17d   :  { %1392 = vst [vmem:[%s3537_s3 + $0x1f0] sm:$0xff] %v884_v48  ;;  %1512 = vst [vmem:[%s3537_s3 + $0x5b0] sm:$0xff] %v1184_v49  ;;  %v886_v50 = vpop.f32.mrb[63].mxu0  ;;  %v1186_v51 = vpop.f32.mrb[63].mxu1 }
 0x17e   :  { %1393 = vst.msk [vmem:[%s3537_s3 + $0x1f8] sm:$0xff] %vm1330_vm1, %v886_v50  ;;  %1513 = vst.msk [vmem:[%s3537_s3 + $0x5b8] sm:$0xff] %vm1330_vm1, %v1186_v51 }
 0x182   :  { %v890_v52 = vpop.f32.mrb[64].mxu0  ;;  %v1190_v53 = vpop.f32.mrb[64].mxu1 }
 0x183   :  { %1394 = vst [vmem:[%s3537_s3 + $0x200] sm:$0xff] %v890_v52  ;;  %1514 = vst [vmem:[%s3537_s3 + $0x5c0] sm:$0xff] %v1190_v53  ;;  %v892_v54 = vpop.f32.mrb[65].mxu0  ;;  %v1192_v55 = vpop.f32.mrb[65].mxu1 }
 0x184   :  { %1395 = vst.msk [vmem:[%s3537_s3 + $0x208] sm:$0xff] %vm1330_vm1, %v892_v54  ;;  %1515 = vst.msk [vmem:[%s3537_s3 + $0x5c8] sm:$0xff] %vm1330_vm1, %v1192_v55  ;;  %v894_v56 = vpop.f32.mrb[66].mxu0  ;;  %v1194_v57 = vpop.f32.mrb[66].mxu1 }
 0x185   :  { %1396 = vst [vmem:[%s3537_s3 + $0x210] sm:$0xff] %v894_v56  ;;  %1516 = vst [vmem:[%s3537_s3 + $0x5d0] sm:$0xff] %v1194_v57  ;;  %v896_v58 = vpop.f32.mrb[67].mxu0  ;;  %v1196_v59 = vpop.f32.mrb[67].mxu1 }
 0x186   :  { %1397 = vst.msk [vmem:[%s3537_s3 + $0x218] sm:$0xff] %vm1330_vm1, %v896_v58  ;;  %1517 = vst.msk [vmem:[%s3537_s3 + $0x5d8] sm:$0xff] %vm1330_vm1, %v1196_v59 }
 0x18a   :  { %v900_v60 = vpop.f32.mrb[68].mxu0  ;;  %v1200_v61 = vpop.f32.mrb[68].mxu1 }
 0x18b   :  { %1398 = vst [vmem:[%s3537_s3 + $0x220] sm:$0xff] %v900_v60  ;;  %1518 = vst [vmem:[%s3537_s3 + $0x5e0] sm:$0xff] %v1200_v61  ;;  %v902_v62 = vpop.f32.mrb[69].mxu0  ;;  %v1202_v63 = vpop.f32.mrb[69].mxu1 }
 0x18c   :  { %1399 = vst.msk [vmem:[%s3537_s3 + $0x228] sm:$0xff] %vm1330_vm1, %v902_v62  ;;  %1519 = vst.msk [vmem:[%s3537_s3 + $0x5e8] sm:$0xff] %vm1330_vm1, %v1202_v63  ;;  %v904_v0 = vpop.f32.mrb[70].mxu0  ;;  %v1204_v1 = vpop.f32.mrb[70].mxu1 }
 0x18d   :  { %1400 = vst [vmem:[%s3537_s3 + $0x230] sm:$0xff] %v904_v0  ;;  %1520 = vst [vmem:[%s3537_s3 + $0x5f0] sm:$0xff] %v1204_v1  ;;  %v906_v2 = vpop.f32.mrb[71].mxu0  ;;  %v1206_v3 = vpop.f32.mrb[71].mxu1 }
 0x18e   :  { %1401 = vst.msk [vmem:[%s3537_s3 + $0x238] sm:$0xff] %vm1330_vm1, %v906_v2  ;;  %1521 = vst.msk [vmem:[%s3537_s3 + $0x5f8] sm:$0xff] %vm1330_vm1, %v1206_v3 }
 0x192   :  { %v910_v4 = vpop.f32.mrb[72].mxu0  ;;  %v1210_v5 = vpop.f32.mrb[72].mxu1 }
 0x193   :  { %1402 = vst [vmem:[%s3537_s3 + $0x240] sm:$0xff] %v910_v4  ;;  %1522 = vst [vmem:[%s3537_s3 + $0x600] sm:$0xff] %v1210_v5  ;;  %v912_v6 = vpop.f32.mrb[73].mxu0  ;;  %v1212_v7 = vpop.f32.mrb[73].mxu1 }
 0x194   :  { %1403 = vst.msk [vmem:[%s3537_s3 + $0x248] sm:$0xff] %vm1330_vm1, %v912_v6  ;;  %1523 = vst.msk [vmem:[%s3537_s3 + $0x608] sm:$0xff] %vm1330_vm1, %v1212_v7  ;;  %v914_v8 = vpop.f32.mrb[74].mxu0  ;;  %v1214_v9 = vpop.f32.mrb[74].mxu1 }
 0x195   :  { %1404 = vst [vmem:[%s3537_s3 + $0x250] sm:$0xff] %v914_v8  ;;  %1524 = vst [vmem:[%s3537_s3 + $0x610] sm:$0xff] %v1214_v9  ;;  %v916_v10 = vpop.f32.mrb[75].mxu0  ;;  %v1216_v11 = vpop.f32.mrb[75].mxu1 }
 0x196   :  { %1405 = vst.msk [vmem:[%s3537_s3 + $0x258] sm:$0xff] %vm1330_vm1, %v916_v10  ;;  %1525 = vst.msk [vmem:[%s3537_s3 + $0x618] sm:$0xff] %vm1330_vm1, %v1216_v11 }
 0x19a   :  { %v920_v12 = vpop.f32.mrb[76].mxu0  ;;  %v1220_v13 = vpop.f32.mrb[76].mxu1 }
 0x19b   :  { %1406 = vst [vmem:[%s3537_s3 + $0x260] sm:$0xff] %v920_v12  ;;  %1526 = vst [vmem:[%s3537_s3 + $0x620] sm:$0xff] %v1220_v13  ;;  %v922_v14 = vpop.f32.mrb[77].mxu0  ;;  %v1222_v15 = vpop.f32.mrb[77].mxu1 }
 0x19c   :  { %1407 = vst.msk [vmem:[%s3537_s3 + $0x268] sm:$0xff] %vm1330_vm1, %v922_v14  ;;  %1527 = vst.msk [vmem:[%s3537_s3 + $0x628] sm:$0xff] %vm1330_vm1, %v1222_v15  ;;  %v924_v16 = vpop.f32.mrb[78].mxu0  ;;  %v1224_v17 = vpop.f32.mrb[78].mxu1 }
 0x19d   :  { %1408 = vst [vmem:[%s3537_s3 + $0x270] sm:$0xff] %v924_v16  ;;  %1528 = vst [vmem:[%s3537_s3 + $0x630] sm:$0xff] %v1224_v17  ;;  %v926_v18 = vpop.f32.mrb[79].mxu0  ;;  %v1226_v19 = vpop.f32.mrb[79].mxu1 }
 0x19e   :  { %1409 = vst.msk [vmem:[%s3537_s3 + $0x278] sm:$0xff] %vm1330_vm1, %v926_v18  ;;  %1529 = vst.msk [vmem:[%s3537_s3 + $0x638] sm:$0xff] %vm1330_vm1, %v1226_v19 }
 0x1a2   :  { %v930_v20 = vpop.f32.mrb[80].mxu0  ;;  %v1230_v21 = vpop.f32.mrb[80].mxu1 }
 0x1a3   :  { %1410 = vst [vmem:[%s3537_s3 + $0x280] sm:$0xff] %v930_v20  ;;  %1530 = vst [vmem:[%s3537_s3 + $0x640] sm:$0xff] %v1230_v21  ;;  %v932_v22 = vpop.f32.mrb[81].mxu0  ;;  %v1232_v23 = vpop.f32.mrb[81].mxu1 }
 0x1a4   :  { %1411 = vst.msk [vmem:[%s3537_s3 + $0x288] sm:$0xff] %vm1330_vm1, %v932_v22  ;;  %1531 = vst.msk [vmem:[%s3537_s3 + $0x648] sm:$0xff] %vm1330_vm1, %v1232_v23  ;;  %v934_v24 = vpop.f32.mrb[82].mxu0  ;;  %v1234_v25 = vpop.f32.mrb[82].mxu1 }
 0x1a5   :  { %1412 = vst [vmem:[%s3537_s3 + $0x290] sm:$0xff] %v934_v24  ;;  %1532 = vst [vmem:[%s3537_s3 + $0x650] sm:$0xff] %v1234_v25  ;;  %v936_v26 = vpop.f32.mrb[83].mxu0  ;;  %v1236_v27 = vpop.f32.mrb[83].mxu1 }
 0x1a6   :  { %1413 = vst.msk [vmem:[%s3537_s3 + $0x298] sm:$0xff] %vm1330_vm1, %v936_v26  ;;  %1533 = vst.msk [vmem:[%s3537_s3 + $0x658] sm:$0xff] %vm1330_vm1, %v1236_v27 }
 0x1aa   :  { %v940_v28 = vpop.f32.mrb[84].mxu0  ;;  %v1240_v29 = vpop.f32.mrb[84].mxu1 }
 0x1ab   :  { %1414 = vst [vmem:[%s3537_s3 + $0x2a0] sm:$0xff] %v940_v28  ;;  %1534 = vst [vmem:[%s3537_s3 + $0x660] sm:$0xff] %v1240_v29  ;;  %v942_v30 = vpop.f32.mrb[85].mxu0  ;;  %v1242_v31 = vpop.f32.mrb[85].mxu1 }
 0x1ac   :  { %1415 = vst.msk [vmem:[%s3537_s3 + $0x2a8] sm:$0xff] %vm1330_vm1, %v942_v30  ;;  %1535 = vst.msk [vmem:[%s3537_s3 + $0x668] sm:$0xff] %vm1330_vm1, %v1242_v31  ;;  %v944_v32 = vpop.f32.mrb[86].mxu0  ;;  %v1244_v33 = vpop.f32.mrb[86].mxu1 }
 0x1ad   :  { %1416 = vst [vmem:[%s3537_s3 + $0x2b0] sm:$0xff] %v944_v32  ;;  %1536 = vst [vmem:[%s3537_s3 + $0x670] sm:$0xff] %v1244_v33  ;;  %v946_v34 = vpop.f32.mrb[87].mxu0  ;;  %v1246_v35 = vpop.f32.mrb[87].mxu1 }
 0x1ae   :  { %1417 = vst.msk [vmem:[%s3537_s3 + $0x2b8] sm:$0xff] %vm1330_vm1, %v946_v34  ;;  %1537 = vst.msk [vmem:[%s3537_s3 + $0x678] sm:$0xff] %vm1330_vm1, %v1246_v35 }
 0x1b2   :  { %v950_v36 = vpop.f32.mrb[88].mxu0  ;;  %v1250_v37 = vpop.f32.mrb[88].mxu1 }
 0x1b3   :  { %1418 = vst [vmem:[%s3537_s3 + $0x2c0] sm:$0xff] %v950_v36  ;;  %1538 = vst [vmem:[%s3537_s3 + $0x680] sm:$0xff] %v1250_v37  ;;  %v952_v38 = vpop.f32.mrb[89].mxu0  ;;  %v1252_v39 = vpop.f32.mrb[89].mxu1 }
 0x1b4   :  { %1419 = vst.msk [vmem:[%s3537_s3 + $0x2c8] sm:$0xff] %vm1330_vm1, %v952_v38  ;;  %1539 = vst.msk [vmem:[%s3537_s3 + $0x688] sm:$0xff] %vm1330_vm1, %v1252_v39  ;;  %v954_v40 = vpop.f32.mrb[90].mxu0  ;;  %v1254_v41 = vpop.f32.mrb[90].mxu1 }
 0x1b5   :  { %1420 = vst [vmem:[%s3537_s3 + $0x2d0] sm:$0xff] %v954_v40  ;;  %1540 = vst [vmem:[%s3537_s3 + $0x690] sm:$0xff] %v1254_v41  ;;  %v956_v42 = vpop.f32.mrb[91].mxu0  ;;  %v1256_v43 = vpop.f32.mrb[91].mxu1 }
 0x1b6   :  { %1421 = vst.msk [vmem:[%s3537_s3 + $0x2d8] sm:$0xff] %vm1330_vm1, %v956_v42  ;;  %1541 = vst.msk [vmem:[%s3537_s3 + $0x698] sm:$0xff] %vm1330_vm1, %v1256_v43 }
 0x1ba   :  { %v960_v44 = vpop.f32.mrb[92].mxu0  ;;  %v1260_v45 = vpop.f32.mrb[92].mxu1 }
 0x1bb   :  { %1422 = vst [vmem:[%s3537_s3 + $0x2e0] sm:$0xff] %v960_v44  ;;  %1542 = vst [vmem:[%s3537_s3 + $0x6a0] sm:$0xff] %v1260_v45  ;;  %v962_v46 = vpop.f32.mrb[93].mxu0  ;;  %v1262_v47 = vpop.f32.mrb[93].mxu1 }
 0x1bc   :  { %1423 = vst.msk [vmem:[%s3537_s3 + $0x2e8] sm:$0xff] %vm1330_vm1, %v962_v46  ;;  %1543 = vst.msk [vmem:[%s3537_s3 + $0x6a8] sm:$0xff] %vm1330_vm1, %v1262_v47  ;;  %v964_v48 = vpop.f32.mrb[94].mxu0  ;;  %v1264_v49 = vpop.f32.mrb[94].mxu1 }
 0x1bd   :  { %1424 = vst [vmem:[%s3537_s3 + $0x2f0] sm:$0xff] %v964_v48  ;;  %1544 = vst [vmem:[%s3537_s3 + $0x6b0] sm:$0xff] %v1264_v49  ;;  %v966_v50 = vpop.f32.mrb[95].mxu0  ;;  %v1266_v51 = vpop.f32.mrb[95].mxu1 }
 0x1be   :  { %1425 = vst.msk [vmem:[%s3537_s3 + $0x2f8] sm:$0xff] %vm1330_vm1, %v966_v50  ;;  %1545 = vst.msk [vmem:[%s3537_s3 + $0x6b8] sm:$0xff] %vm1330_vm1, %v1266_v51 }
 0x1c2   :  { %v970_v52 = vpop.f32.mrb[96].mxu0  ;;  %v1270_v53 = vpop.f32.mrb[96].mxu1 }
 0x1c3   :  { %1426 = vst [vmem:[%s3537_s3 + $0x300] sm:$0xff] %v970_v52  ;;  %1546 = vst [vmem:[%s3537_s3 + $0x6c0] sm:$0xff] %v1270_v53  ;;  %v972_v54 = vpop.f32.mrb[97].mxu0  ;;  %v1272_v55 = vpop.f32.mrb[97].mxu1 }
 0x1c4   :  { %1427 = vst.msk [vmem:[%s3537_s3 + $0x308] sm:$0xff] %vm1330_vm1, %v972_v54  ;;  %1547 = vst.msk [vmem:[%s3537_s3 + $0x6c8] sm:$0xff] %vm1330_vm1, %v1272_v55  ;;  %v974_v56 = vpop.f32.mrb[98].mxu0  ;;  %v1274_v57 = vpop.f32.mrb[98].mxu1 }
 0x1c5   :  { %1428 = vst [vmem:[%s3537_s3 + $0x310] sm:$0xff] %v974_v56  ;;  %1548 = vst [vmem:[%s3537_s3 + $0x6d0] sm:$0xff] %v1274_v57  ;;  %v976_v58 = vpop.f32.mrb[99].mxu0  ;;  %v1276_v59 = vpop.f32.mrb[99].mxu1 }
 0x1c6   :  { %1429 = vst.msk [vmem:[%s3537_s3 + $0x318] sm:$0xff] %vm1330_vm1, %v976_v58  ;;  %1549 = vst.msk [vmem:[%s3537_s3 + $0x6d8] sm:$0xff] %vm1330_vm1, %v1276_v59 }
 0x1ca   :  { %v980_v60 = vpop.f32.mrb[100].mxu0  ;;  %v1280_v61 = vpop.f32.mrb[100].mxu1 }
 0x1cb   :  { %1430 = vst [vmem:[%s3537_s3 + $0x320] sm:$0xff] %v980_v60  ;;  %1550 = vst [vmem:[%s3537_s3 + $0x6e0] sm:$0xff] %v1280_v61  ;;  %v982_v62 = vpop.f32.mrb[101].mxu0  ;;  %v1282_v63 = vpop.f32.mrb[101].mxu1 }
 0x1cc   :  { %1431 = vst.msk [vmem:[%s3537_s3 + $0x328] sm:$0xff] %vm1330_vm1, %v982_v62  ;;  %1551 = vst.msk [vmem:[%s3537_s3 + $0x6e8] sm:$0xff] %vm1330_vm1, %v1282_v63  ;;  %v984_v0 = vpop.f32.mrb[102].mxu0  ;;  %v1284_v1 = vpop.f32.mrb[102].mxu1 }
 0x1cd   :  { %1432 = vst [vmem:[%s3537_s3 + $0x330] sm:$0xff] %v984_v0  ;;  %1552 = vst [vmem:[%s3537_s3 + $0x6f0] sm:$0xff] %v1284_v1  ;;  %v986_v2 = vpop.f32.mrb[103].mxu0  ;;  %v1286_v3 = vpop.f32.mrb[103].mxu1 }
 0x1ce   :  { %1433 = vst.msk [vmem:[%s3537_s3 + $0x338] sm:$0xff] %vm1330_vm1, %v986_v2  ;;  %1553 = vst.msk [vmem:[%s3537_s3 + $0x6f8] sm:$0xff] %vm1330_vm1, %v1286_v3 }
 0x1d2   :  { %v990_v4 = vpop.f32.mrb[104].mxu0  ;;  %v1290_v5 = vpop.f32.mrb[104].mxu1 }
 0x1d3   :  { %1434 = vst [vmem:[%s3537_s3 + $0x340] sm:$0xff] %v990_v4  ;;  %1554 = vst [vmem:[%s3537_s3 + $0x700] sm:$0xff] %v1290_v5  ;;  %v992_v6 = vpop.f32.mrb[105].mxu0  ;;  %v1292_v7 = vpop.f32.mrb[105].mxu1 }
 0x1d4   :  { %1435 = vst.msk [vmem:[%s3537_s3 + $0x348] sm:$0xff] %vm1330_vm1, %v992_v6  ;;  %1555 = vst.msk [vmem:[%s3537_s3 + $0x708] sm:$0xff] %vm1330_vm1, %v1292_v7  ;;  %v994_v8 = vpop.f32.mrb[106].mxu0  ;;  %v1294_v9 = vpop.f32.mrb[106].mxu1 }
 0x1d5   :  { %1436 = vst [vmem:[%s3537_s3 + $0x350] sm:$0xff] %v994_v8  ;;  %1556 = vst [vmem:[%s3537_s3 + $0x710] sm:$0xff] %v1294_v9  ;;  %v996_v10 = vpop.f32.mrb[107].mxu0  ;;  %v1296_v11 = vpop.f32.mrb[107].mxu1 }
 0x1d6   :  { %1437 = vst.msk [vmem:[%s3537_s3 + $0x358] sm:$0xff] %vm1330_vm1, %v996_v10  ;;  %1557 = vst.msk [vmem:[%s3537_s3 + $0x718] sm:$0xff] %vm1330_vm1, %v1296_v11 }
 0x1da   :  { %v1000_v12 = vpop.f32.mrb[108].mxu0  ;;  %v1300_v13 = vpop.f32.mrb[108].mxu1 }
 0x1db   :  { %1438 = vst [vmem:[%s3537_s3 + $0x360] sm:$0xff] %v1000_v12  ;;  %1558 = vst [vmem:[%s3537_s3 + $0x720] sm:$0xff] %v1300_v13  ;;  %v1002_v14 = vpop.f32.mrb[109].mxu0  ;;  %v1302_v15 = vpop.f32.mrb[109].mxu1 }
 0x1dc   :  { %1439 = vst.msk [vmem:[%s3537_s3 + $0x368] sm:$0xff] %vm1330_vm1, %v1002_v14  ;;  %1559 = vst.msk [vmem:[%s3537_s3 + $0x728] sm:$0xff] %vm1330_vm1, %v1302_v15  ;;  %v1004_v16 = vpop.f32.mrb[110].mxu0  ;;  %v1304_v17 = vpop.f32.mrb[110].mxu1 }
 0x1dd   :  { %1440 = vst [vmem:[%s3537_s3 + $0x370] sm:$0xff] %v1004_v16  ;;  %1560 = vst [vmem:[%s3537_s3 + $0x730] sm:$0xff] %v1304_v17  ;;  %v1006_v18 = vpop.f32.mrb[111].mxu0  ;;  %v1306_v19 = vpop.f32.mrb[111].mxu1 }
 0x1de   :  { %1441 = vst.msk [vmem:[%s3537_s3 + $0x378] sm:$0xff] %vm1330_vm1, %v1006_v18  ;;  %1561 = vst.msk [vmem:[%s3537_s3 + $0x738] sm:$0xff] %vm1330_vm1, %v1306_v19 }
 0x1e2   :  { %v1010_v20 = vpop.f32.mrb[112].mxu0  ;;  %v1310_v21 = vpop.f32.mrb[112].mxu1 }
 0x1e3   :  { %1442 = vst [vmem:[%s3537_s3 + $0x380] sm:$0xff] %v1010_v20  ;;  %1562 = vst [vmem:[%s3537_s3 + $0x740] sm:$0xff] %v1310_v21  ;;  %v1012_v22 = vpop.f32.mrb[113].mxu0  ;;  %v1312_v23 = vpop.f32.mrb[113].mxu1 }
 0x1e4   :  { %1443 = vst.msk [vmem:[%s3537_s3 + $0x388] sm:$0xff] %vm1330_vm1, %v1012_v22  ;;  %1563 = vst.msk [vmem:[%s3537_s3 + $0x748] sm:$0xff] %vm1330_vm1, %v1312_v23  ;;  %v1014_v24 = vpop.f32.mrb[114].mxu0  ;;  %v1314_v25 = vpop.f32.mrb[114].mxu1 }
 0x1e5   :  { %1444 = vst [vmem:[%s3537_s3 + $0x390] sm:$0xff] %v1014_v24  ;;  %1564 = vst [vmem:[%s3537_s3 + $0x750] sm:$0xff] %v1314_v25  ;;  %v1016_v26 = vpop.f32.mrb[115].mxu0  ;;  %v1316_v27 = vpop.f32.mrb[115].mxu1 }
 0x1e6   :  { %1445 = vst.msk [vmem:[%s3537_s3 + $0x398] sm:$0xff] %vm1330_vm1, %v1016_v26  ;;  %1565 = vst.msk [vmem:[%s3537_s3 + $0x758] sm:$0xff] %vm1330_vm1, %v1316_v27 }
 0x1ea   :  { %v1020_v28 = vpop.f32.mrb[116].mxu0  ;;  %v1320_v29 = vpop.f32.mrb[116].mxu1 }
 0x1eb   :  { %1446 = vst [vmem:[%s3537_s3 + $0x3a0] sm:$0xff] %v1020_v28  ;;  %1566 = vst [vmem:[%s3537_s3 + $0x760] sm:$0xff] %v1320_v29  ;;  %v1022_v30 = vpop.f32.mrb[117].mxu0  ;;  %v1322_v31 = vpop.f32.mrb[117].mxu1 }
 0x1ec   :  { %1447 = vst.msk [vmem:[%s3537_s3 + $0x3a8] sm:$0xff] %vm1330_vm1, %v1022_v30  ;;  %1567 = vst.msk [vmem:[%s3537_s3 + $0x768] sm:$0xff] %vm1330_vm1, %v1322_v31  ;;  %v1024_v32 = vpop.f32.mrb[118].mxu0  ;;  %v1324_v33 = vpop.f32.mrb[118].mxu1 }
 0x1ed   :  { %1448 = vst [vmem:[%s3537_s3 + $0x3b0] sm:$0xff] %v1024_v32  ;;  %1568 = vst [vmem:[%s3537_s3 + $0x770] sm:$0xff] %v1324_v33  ;;  %v1026_v34 = vpop.f32.mrb[119].mxu0  ;;  %v1326_v35 = vpop.f32.mrb[119].mxu1 }
 0x1ee   :  { %1449 = vst.msk [vmem:[%s3537_s3 + $0x3b8] sm:$0xff] %vm1330_vm1, %v1026_v34  ;;  %1569 = vst.msk [vmem:[%s3537_s3 + $0x778] sm:$0xff] %vm1330_vm1, %v1326_v35 }

</bundles_post_ra>
